<compile_context>
chip_gen: v7x
topology: tpu7x:2x2x1
jax: 0.10.0
libtpu: 0.0.40
codegen_flags: <defaults>
</compile_context>

<pallas_src>
import functools

import jax
import jax.numpy as jnp
from jax.experimental import pallas as pl
from jax.experimental.pallas import tpu as pltpu


def regress_head_kernel(x_ref, w1_ref, b1_ref, w2_ref, b2_ref, w3_ref, b3_ref, o_ref):
    # x_ref : (1, C_in, tl) f32      w1: (512, C_in) bf16   b1: (512, 1) bf16|f32
    # w2    : (128, 512) bf16        b2: (128, 1) f32
    # w3    : (128, 1)   f32         b3: (1, 1)   f32
    # o_ref : (1, 1, 1, tl) f32
    x = x_ref[0].astype(jnp.bfloat16)                                # (C_in, tl) bf16

    # Layer 1: 1x1 conv (+ folded BN), f32 accumulation on the MXU; epilogue
    # (bias + ReLU) in the chip-appropriate dtype (bf16 on v6e/v7x, f32 on v5e),
    # chosen by b1's dtype.
    h1 = jnp.dot(w1_ref[...], x, preferred_element_type=jnp.float32)  # (512, tl) f32
    h1 = h1.astype(b1_ref.dtype)
    h1 = jnp.maximum(h1 + b1_ref[...], 0).astype(jnp.bfloat16)        # (512, tl) bf16

    # Layer 2: 1x1 conv (+ folded BN) + ReLU, f32 epilogue (slab is 4x smaller).
    h2 = jnp.dot(w2_ref[...], h1, preferred_element_type=jnp.float32)
    h2 = jnp.maximum(h2 + b2_ref[...], 0.0)                           # (128, tl) f32

    # Layer 3: 128 -> 1 conv done on VPU (+ sublane reduce on XLU), not the MXU.
    out = jnp.sum(h2 * w3_ref[...], axis=0, keepdims=True) + b3_ref[...]   # (1, tl)
    o_ref[...] = out.reshape(o_ref.shape).astype(o_ref.dtype)


def _fold_bn(w, b, gamma, beta, mean, var, eps=1e-5):
    """Fold eval-mode BatchNorm1d into a pointwise (1x1) conv.

    w: (C_out, C_in), b: (C_out,). Returns folded (w', b') in f32."""
    s = gamma / jnp.sqrt(var + eps)        # (C_out,)
    w_f = w * s[:, None]
    b_f = b * s + (beta - mean * s)
    return w_f, b_f


def _epilogue_dtype():
    """bf16 epilogue only where the VPU has bf16 ALUs (v6e / v7x)."""
    try:
        kind = jax.devices()[0].device_kind.lower()
    except Exception:
        return jnp.float32
    if "v6" in kind or "v7" in kind:
        return jnp.bfloat16
    return jnp.float32


@functools.partial(jax.jit, static_argnames=("tl",))
def regress_head_forward(x, params, tl=2048):
    """x: (B, C_in, L) float32 -> (B, L) float32 (matches PyTorch RegressHead, eval BN)."""
    B, C_in, L = x.shape
    assert tl % 256 == 0 and 256 <= tl <= 4096, "tl must be a multiple of 256 in [256, 4096]"

    # ---- choose the effective position tile (all static Python ints) ----
    tl_eff = tl
    if L < tl_eff:
        # never let the block exceed the array extent: largest 128-multiple <= L
        tl_eff = max(128, (L // 128) * 128)
    if B == 1 and L >= 256:
        # v7x has 2 TensorCores; keep >= 2 cells on the parallel grid when possible.
        tl_eff = min(tl_eff, max(128, ((L // 2) // 128) * 128))
    J = -(-L // tl_eff)
    L_pad = J * tl_eff
    if L < tl_eff:
        # degenerate tiny-L case (L < 128): pad up to one lane tile (cheap, tiny).
        x = jnp.pad(x, ((0, 0), (0, 0), (0, tl_eff - L)))

    # ---- fold BN layers into the preceding 1x1 convs (eval-mode semantics) ----
    w1, b1 = _fold_bn(params["w1"], params["b1"], params["g1"], params["be1"],
                      params["m1"], params["v1"])
    w2, b2 = _fold_bn(params["w2"], params["b2"], params["g2"], params["be2"],
                      params["m2"], params["v2"])
    w3, b3 = params["w3"], params["b3"]
    H1, H2 = w1.shape[0], w2.shape[0]

    epi = _epilogue_dtype()
    # bf16 operands for native MXU throughput; accumulation stays f32 in the kernel.
    w1c = w1.astype(jnp.bfloat16)                # (512, C_in)
    w2c = w2.astype(jnp.bfloat16)                # (128, 512)
    b1c = b1.reshape(-1, 1).astype(epi)          # (512, 1) bf16 (v6e/v7x) or f32 (v5e)
    b2c = b2.reshape(-1, 1)                      # (128, 1) f32
    w3c = w3.reshape(-1, 1).astype(jnp.float32)  # (128, 1) f32 (VPU path)
    b3r = b3.reshape(1, 1)                       # (1, 1)  f32

    # ---- scheduling hints ----
    vmem_limit = (48 if tl_eff >= 1024 else 32) * 1024 * 1024
    flops = 2 * B * L_pad * (H1 * C_in + H2 * H1 + H2)
    bytes_accessed = (B * C_in * L * 4 + B * L_pad * 4
                      + (H1 * C_in + H2 * H1) * 2 + (H1 + H2 + H2 + 1) * 4)
    cost = pl.CostEstimate(flops=flops, transcendentals=0,
                           bytes_accessed=int(bytes_accessed))

    out4 = pl.pallas_call(
        regress_head_kernel,
        out_shape=jax.ShapeDtypeStruct((B, J, 1, tl_eff), jnp.float32),
        grid_spec=pltpu.PrefetchScalarGridSpec(
            num_scalar_prefetch=0,
            grid=(B, J),
            in_specs=[
                # x tile in native NCL layout; last block may be partial in L.
                pl.BlockSpec((1, C_in, tl_eff), lambda b, j: (b, 0, j)),
                pl.BlockSpec(w1c.shape, lambda b, j: (0, 0)),   # w1 (full, resident)
                pl.BlockSpec(b1c.shape, lambda b, j: (0, 0)),   # b1
                pl.BlockSpec(w2c.shape, lambda b, j: (0, 0)),   # w2
                pl.BlockSpec(b2c.shape, lambda b, j: (0, 0)),   # b2
                pl.BlockSpec(w3c.shape, lambda b, j: (0, 0)),   # w3
                pl.BlockSpec(b3r.shape, lambda b, j: (0, 0)),   # b3
            ],
            # Lane-dense output block: last dim = tl_eff (multiple of 128) -> unmasked vst.
            out_specs=pl.BlockSpec((1, 1, 1, tl_eff), lambda b, j: (b, j, 0, 0)),
        ),
        compiler_params=pltpu.CompilerParams(
            dimension_semantics=("parallel", "parallel"),
            vmem_limit_bytes=vmem_limit,
        ),
        cost_estimate=cost,
    )(x, w1c, b1c, w2c, b2c, w3c, b3r)

    # (B, J, 1, tl) -> (B, L_pad) -> drop the don't-care tail positions.
    return out4.reshape(B, L_pad)[:, :L]


def init_params(key, input_dim):
    ks = jax.random.split(key, 8)
    h1, h2 = 512, 128
    params = {
        # Conv1d(input_dim, 512, 1): weight (512, input_dim, 1) -> squeeze k dim.
        "w1": jax.random.normal(ks[0], (h1, input_dim), jnp.float32) * 0.05,
        "b1": jax.random.normal(ks[1], (h1,), jnp.float32) * 0.05,
        # BatchNorm1d(512) eval-mode params / running stats.
        "g1": jnp.ones((h1,), jnp.float32),
        "be1": jnp.zeros((h1,), jnp.float32),
        "m1": jax.random.normal(ks[2], (h1,), jnp.float32) * 0.01,
        "v1": jnp.ones((h1,), jnp.float32),
        # Conv1d(512, 128, 1)
        "w2": jax.random.normal(ks[3], (h2, h1), jnp.float32) * 0.05,
        "b2": jax.random.normal(ks[4], (h2,), jnp.float32) * 0.05,
        # BatchNorm1d(128)
        "g2": jnp.ones((h2,), jnp.float32),
        "be2": jnp.zeros((h2,), jnp.float32),
        "m2": jax.random.normal(ks[5], (h2,), jnp.float32) * 0.01,
        "v2": jnp.ones((h2,), jnp.float32),
        # Conv1d(128, 1, 1)
        "w3": jax.random.normal(ks[6], (1, h2), jnp.float32) * 0.05,
        "b3": jax.random.normal(ks[7], (1,), jnp.float32) * 0.05,
    }
    return params


def reference_forward(x, params):
    """Pure-JAX f32 reference (eval-mode BN) for correctness checking."""
    w1, b1 = _fold_bn(params["w1"], params["b1"], params["g1"], params["be1"],
                      params["m1"], params["v1"])
    w2, b2 = _fold_bn(params["w2"], params["b2"], params["g2"], params["be2"],
                      params["m2"], params["v2"])
    w3, b3 = params["w3"], params["b3"]
    B, C, L = x.shape
    x2 = jnp.transpose(x, (0, 2, 1)).reshape(B * L, C)
    h = jnp.maximum(x2 @ w1.T + b1, 0.0)
    h = jnp.maximum(h @ w2.T + b2, 0.0)
    out = h @ w3.T + b3
    return out.reshape(B, L)


if __name__ == "__main__":
    key = jax.random.PRNGKey(0)
    k_x, k_p = jax.random.split(key)

    # Small-but-representative shapes: L=384 with tl=256 exercises both grid axes
    # (grid = (2, 2), all parallel) and the partial-last-input-block path (384 = 256+128).
    B, input_dim, L = 2, 32, 384
    x = jax.random.normal(k_x, (B, input_dim, L), jnp.float32)
    params = init_params(k_p, input_dim)

    ref = reference_forward(x, params)

    # Explicit small tile: grid (2, 2), non-divisible L handled by a partial input block.
    out_small = jax.block_until_ready(regress_head_forward(x, params, tl=256))
    assert out_small.shape == (B, L), f"bad output shape {out_small.shape}"
    # bf16 operands / bf16 layer-1 epilogue with f32 accumulation -> relaxed tolerance.
    assert jnp.allclose(out_small, ref, atol=3e-2, rtol=3e-2), "mismatch vs reference (tl=256)"

    # Default tile (2048): auto-clamps to tl_eff=384 here, exercising the clamp path.
    out_default = jax.block_until_ready(regress_head_forward(x, params))
    assert out_default.shape == (B, L), f"bad output shape {out_default.shape}"
    assert jnp.allclose(out_default, ref, atol=3e-2, rtol=3e-2), "mismatch vs reference (default tl)"

    print("KERNEL_OK")
</pallas_src>

<mosaic_0001>
module attributes {stable_mosaic.version = 11 : i64} {
  func.func @regress_head_kernel(%arg0: i32, %arg1: i32, %arg2: memref<1x32x256xf32, #tpu.memory_space<vmem>>, %arg3: memref<512x32xbf16, #tpu.memory_space<vmem>>, %arg4: memref<512x1xf32, #tpu.memory_space<vmem>>, %arg5: memref<128x512xbf16, #tpu.memory_space<vmem>>, %arg6: memref<128x1xf32, #tpu.memory_space<vmem>>, %arg7: memref<128x1xf32, #tpu.memory_space<vmem>>, %arg8: memref<1x1xf32, #tpu.memory_space<vmem>>, %arg9: memref<1x1x1x256xf32, #tpu.memory_space<vmem>>) attributes {dimension_semantics = [#tpu.dimension_semantics<parallel>, #tpu.dimension_semantics<parallel>], iteration_bounds = array<i64: 2, 2>, scalar_prefetch = 0 : i64, scratch_operands = 0 : i64, tpu.core_type = #tpu.core_type<tc>, window_params = [{transform_indices = @transform_0, window_bounds = array<i64: 1, 32, 256>}, {pipeline_mode = #tpu.pipeline_mode<synchronous>, transform_indices = @transform_1, window_bounds = array<i64: 512, 32>}, {pipeline_mode = #tpu.pipeline_mode<synchronous>, transform_indices = @transform_2, window_bounds = array<i64: 512, 1>}, {pipeline_mode = #tpu.pipeline_mode<synchronous>, transform_indices = @transform_3, window_bounds = array<i64: 128, 512>}, {pipeline_mode = #tpu.pipeline_mode<synchronous>, transform_indices = @transform_4, window_bounds = array<i64: 128, 1>}, {pipeline_mode = #tpu.pipeline_mode<synchronous>, transform_indices = @transform_5, window_bounds = array<i64: 128, 1>}, {pipeline_mode = #tpu.pipeline_mode<synchronous>, transform_indices = @transform_6, window_bounds = array<i64: 1, 1>}, {transform_indices = @transform_7, window_bounds = array<i64: 1, 1, 1, 256>}]} {
    %c0 = arith.constant 0 : index
    %c0_0 = arith.constant 0 : index
    %c0_1 = arith.constant 0 : index
    %0 = vector.load %arg2[%c0, %c0_0, %c0_1] : memref<1x32x256xf32, #tpu.memory_space<vmem>>, vector<1x32x256xf32>
    %1 = vector.shape_cast %0 : vector<1x32x256xf32> to vector<32x256xf32>
    %2 = arith.truncf %1 : vector<32x256xf32> to vector<32x256xbf16>
    %c0_2 = arith.constant 0 : index
    %c0_3 = arith.constant 0 : index
    %3 = vector.load %arg3[%c0_2, %c0_3] : memref<512x32xbf16, #tpu.memory_space<vmem>>, vector<512x32xbf16>
    %cst = arith.constant dense<0.000000e+00> : vector<512x256xf32>
    %4 = tpu.matmul %3, %2, %cst {dimension_numbers = #tpu.dot_dimension_numbers<[1], [0], [0], [1], [0, 0, 1, 1], [], []>} : vector<512x32xbf16>, vector<32x256xbf16>, vector<512x256xf32> -> vector<512x256xf32>
    %c0_4 = arith.constant 0 : index
    %c0_5 = arith.constant 0 : index
    %5 = vector.load %arg4[%c0_4, %c0_5] : memref<512x1xf32, #tpu.memory_space<vmem>>, vector<512x1xf32>
    %6 = vector.broadcast %5 : vector<512x1xf32> to vector<512x256xf32>
    %7 = arith.addf %4, %6 : vector<512x256xf32>
    %cst_6 = arith.constant 0.000000e+00 : f32
    %8 = vector.broadcast %cst_6 : f32 to vector<512x256xf32>
    %9 = arith.maximumf %7, %8 : vector<512x256xf32>
    %10 = arith.truncf %9 : vector<512x256xf32> to vector<512x256xbf16>
    %c0_7 = arith.constant 0 : index
    %c0_8 = arith.constant 0 : index
    %11 = vector.load %arg5[%c0_7, %c0_8] : memref<128x512xbf16, #tpu.memory_space<vmem>>, vector<128x512xbf16>
    %cst_9 = arith.constant dense<0.000000e+00> : vector<128x256xf32>
    %12 = tpu.matmul %11, %10, %cst_9 {dimension_numbers = #tpu.dot_dimension_numbers<[1], [0], [0], [1], [0, 0, 1, 1], [], []>} : vector<128x512xbf16>, vector<512x256xbf16>, vector<128x256xf32> -> vector<128x256xf32>
    %c0_10 = arith.constant 0 : index
    %c0_11 = arith.constant 0 : index
    %13 = vector.load %arg6[%c0_10, %c0_11] : memref<128x1xf32, #tpu.memory_space<vmem>>, vector<128x1xf32>
    %14 = vector.broadcast %13 : vector<128x1xf32> to vector<128x256xf32>
    %15 = arith.addf %12, %14 : vector<128x256xf32>
    %cst_12 = arith.constant 0.000000e+00 : f32
    %16 = vector.broadcast %cst_12 : f32 to vector<128x256xf32>
    %17 = arith.maximumf %15, %16 : vector<128x256xf32>
    %c0_13 = arith.constant 0 : index
    %c0_14 = arith.constant 0 : index
    %18 = vector.load %arg7[%c0_13, %c0_14] : memref<128x1xf32, #tpu.memory_space<vmem>>, vector<128x1xf32>
    %19 = vector.broadcast %18 : vector<128x1xf32> to vector<128x256xf32>
    %20 = arith.mulf %17, %19 : vector<128x256xf32>
    %cst_15 = arith.constant dense<0.000000e+00> : vector<256xf32>
    %21 = vector.multi_reduction <add>, %20, %cst_15 [0] : vector<128x256xf32> to vector<256xf32>
    %22 = vector.shape_cast %21 : vector<256xf32> to vector<1x256xf32>
    %c0_16 = arith.constant 0 : index
    %c0_17 = arith.constant 0 : index
    %23 = vector.load %arg8[%c0_16, %c0_17] : memref<1x1xf32, #tpu.memory_space<vmem>>, vector<1x1xf32>
    %24 = vector.broadcast %23 : vector<1x1xf32> to vector<1x256xf32>
    %25 = arith.addf %22, %24 : vector<1x256xf32>
    %26 = vector.shape_cast %25 : vector<1x256xf32> to vector<1x1x1x256xf32>
    %c0_18 = arith.constant 0 : index
    %c0_19 = arith.constant 0 : index
    %c0_20 = arith.constant 0 : index
    %c0_21 = arith.constant 0 : index
    %27 = vector.load %arg9[%c0_18, %c0_19, %c0_20, %c0_21] : memref<1x1x1x256xf32, #tpu.memory_space<vmem>>, vector<1x1x1x256xf32>
    tpu.vector_store %arg9[%c0_18, %c0_19, %c0_20, %c0_21], %26 {strides = array<i32>} : memref<1x1x1x256xf32, #tpu.memory_space<vmem>>, vector<1x1x1x256xf32>,
    return
  }
  func.func @transform_0(%arg0: i32, %arg1: i32) -> (i32, i32, i32) {
    %c0_i32 = arith.constant 0 : i32
    %c0_i32_0 = arith.constant 0 : i32
    return %arg0, %c0_i32, %arg1 : i32, i32, i32
  }
  func.func @transform_1(%arg0: i32, %arg1: i32) -> (i32, i32) {
    %c0_i32 = arith.constant 0 : i32
    %c0_i32_0 = arith.constant 0 : i32
    %c0_i32_1 = arith.constant 0 : i32
    return %c0_i32, %c0_i32_0 : i32, i32
  }
  func.func @transform_2(%arg0: i32, %arg1: i32) -> (i32, i32) {
    %c0_i32 = arith.constant 0 : i32
    %c0_i32_0 = arith.constant 0 : i32
    %c0_i32_1 = arith.constant 0 : i32
    return %c0_i32, %c0_i32_0 : i32, i32
  }
  func.func @transform_3(%arg0: i32, %arg1: i32) -> (i32, i32) {
    %c0_i32 = arith.constant 0 : i32
    %c0_i32_0 = arith.constant 0 : i32
    %c0_i32_1 = arith.constant 0 : i32
    return %c0_i32, %c0_i32_0 : i32, i32
  }
  func.func @transform_4(%arg0: i32, %arg1: i32) -> (i32, i32) {
    %c0_i32 = arith.constant 0 : i32
    %c0_i32_0 = arith.constant 0 : i32
    %c0_i32_1 = arith.constant 0 : i32
    return %c0_i32, %c0_i32_0 : i32, i32
  }
  func.func @transform_5(%arg0: i32, %arg1: i32) -> (i32, i32) {
    %c0_i32 = arith.constant 0 : i32
    %c0_i32_0 = arith.constant 0 : i32
    %c0_i32_1 = arith.constant 0 : i32
    return %c0_i32, %c0_i32_0 : i32, i32
  }
  func.func @transform_6(%arg0: i32, %arg1: i32) -> (i32, i32) {
    %c0_i32 = arith.constant 0 : i32
    %c0_i32_0 = arith.constant 0 : i32
    %c0_i32_1 = arith.constant 0 : i32
    return %c0_i32, %c0_i32_0 : i32, i32
  }
  func.func @transform_7(%arg0: i32, %arg1: i32) -> (i32, i32, i32, i32) {
    %c0_i32 = arith.constant 0 : i32
    %c0_i32_0 = arith.constant 0 : i32
    %c0_i32_1 = arith.constant 0 : i32
    return %arg0, %arg1, %c0_i32, %c0_i32_0 : i32, i32, i32, i32
  }
}

</mosaic_0001>

<bundles_post_ra>
// kernel: regress_head_forward.1
= control target key start
LH: loop header
LB: loop body
LE: loop exit
PB: predicated region body
PF: predicated region fallthrough
CT: control target
= control target key end

     0   :  { %s4595_s0 = inlined_call_operand.vmem [shape: f32[2,32,384], index: 0, kind: input, shape index: {}]   ;;  %s4596_s1 = inlined_call_operand.vmem [shape: bf16[512,32], index: 1, kind: input, shape index: {}]   ;;  %s4597_s2 = inlined_call_operand.vmem [shape: f32[512,1], index: 2, kind: input, shape index: {}]   ;;  %s4598_s3 = inlined_call_operand.vmem [shape: bf16[128,512], index: 3, kind: input, shape index: {}]   ;;  %s4599_s4 = inlined_call_operand.vmem [shape: f32[128,1], index: 4, kind: input, shape index: {}]   ;;  %s4600_s5 = inlined_call_operand.vmem [shape: f32[128,1], index: 5, kind: input, shape index: {}]   ;;  %s4601_s6 = inlined_call_operand.<no memory space> [shape: f32[1,1], index: 6, kind: input, shape index: {}]   ;;  %s4602_s7 = inlined_call_operand.vmem [shape: f32[2,2,1,256], index: 7, kind: output, shape index: {}]  }
   0x1   :  { %4612 = sst [smem:[#allocation14_spill]] %s4595_s0  ;;  %v12_v0 = vstv %s4601_s6 }
   0x2   :  { %13 = vst [vmem:[#allocation2] sm:$0x1] %v12_v0 }
   0x3   :  { %s3603_s26 = smov 0   ;;  %s3605_s27 = smov 0  }
   0x4   :  { %s3607_s28 = smov 0   ;;  %s3609_s29 = smov 0  }
   0x5   :  { %s3611_s30 = smov 0   ;;  %s3613_s8 = smov 0  }
   0x6   :  { %s3615_s9 = smov 0  }
   0x7 LB: > { %s28_s6 = sadd.s32 1, %s3514_s30  ;;  %s31_s10 = sadd.s32 1, %s3518_s8  ;;  %s3522_s9 = sphi %s3615_s9, %s19_s9   ;;  %s3518_s8 = sphi %s3613_s8, %s4645_s8   ;;  %s3514_s30 = sphi %s3611_s30, %s4644_s30   ;;  %s3510_s29 = sphi %s3609_s29, %s4643_s29   ;;  %s3506_s28 = sphi %s3607_s28, %s4642_s28   ;;  %s3502_s27 = sphi %s3605_s27, %s4641_s27   ;;  %s3498_s26 = sphi %s3603_s26, %s4640_s26  }
   0x8   : > { %p29_p0 = scmp.ge.s32.totalorder %s28_s6, 2  ;;  %p47_p1 = scmp.ne.s32.totalorder %s3502_s27, %s3498_s26 }
   0x9   : > { %p48_p2 = scmp.eq.s32.totalorder %s3522_s9, 0  ;;  %s40_s14 = sadd.s32 1, %s3502_s27 }
   0xa   : > { %s4647_s6 = smov (%p29_p0, %s28_s6), 0  ;;  %s4649_s10 = smov (!%p29_p0, %s31_s10), %s3518_s8 }
   0xb   : > { %4613 = sst [smem:[#allocation4_spill]] %s4647_s6  ;;  %p49_p3 = por %p48_p2, %p47_p1 }
   0xc   : > { %p33_p4 = scmp.ge.s32.totalorder %s4649_s10, 2  ;;  %s36_s11 = ssub.s32 %s3514_s30, %s4647_s6 }
   0xd   : > { %p2931_p6 = scmp.ge.s32.totalorder %s3522_s9, 4 }
   0xe   : > { %s4651_s10 = smov (%p33_p4, %s4649_s10), 0 }
   0xf   : > { %4614 = sst [smem:[#allocation5_spill]] %s4651_s10  ;;  %s35_s12 = ssub.s32 %s3518_s8, %s4651_s10 }
  0x10   : > { %s37_s13 = sor.u32 %s36_s11, %s35_s12  ;;  %245 = sbr.rel (%p2931_p6) target bundleno = 111 (0x6f), region = 40 }
  0x11   : > { %p38_p5 = scmp.eq.s32.totalorder %s37_s13, 0 }
  0x13   : > { %s3654_s15 = scalar_select %p38_p5, %s3502_s27, %s40_s14  }
  0x17   : > { %248 = sbr.rel (!%p49_p3) target bundleno = 111 (0x6f), region = 44  ;;  %s250_s16 = sand.u32 (%p49_p3), 1, %s3502_s27  }
  0x18   : > { %s2933_s17 = sshll.u32 (%p49_p3), %s3514_s30, 1  ;;  %s2932_s18 = sshll.u32 (%p49_p3), %s250_s16, 6 }
  0x19   : > { %s254_s19 = ssub.s32 (%p49_p3), 3, %s2933_s17  ;;  %s3133_s20 = smul.u32 (%p49_p3), 12, %s3518_s8 }
  0x1a   : > { %p255_p7 = scmp.lt.s32.totalorder (%p49_p3), %s254_s19, 2  ;;  %s4615_s0 = sld [smem:[#allocation14_spill]] (%p49_p3) }
  0x1b   : > { %s260_s21 = sadd.s32 (%p49_p3), %s3133_s20, %s2933_s17  ;;  %s3667_s13 = scalar_lea.vmem (%p49_p3), [#allocation3], %s2932_s18  }
  0x1c   : > { %s2936_s23 = sshll.u32 (%p49_p3), %s260_s21, 3 }
  0x1e   : > { %s4653_s19 = smov (!%p255_p7, %s254_s19), 2 }
  0x1f   : > { %s2934_s22 = sshll.u32 %s4653_s19, 9  ;;  %s3665_s12 = sshll.u32 %s4653_s19, 3 }
  0x20   : > { %s3663_s11 = scalar_lea.vmem %s4615_s0, %s2936_s23   ;;  %p2938_p8 = scmp.eq.s32.totalorder %s2934_s22, 0 }
  0x21   : > { %p267_p9 = scmp.lt.u32.totalorder (!%p2938_p8), %s3665_s12, 8 }
  0x22   : > { %266 = sbr.rel (%p2938_p8) target bundleno = 111 (0x6f), region = 48 }
  0x29   : > { %270 = sbr.rel (%p267_p9) target bundleno = 102 (0x66), region = 52  ;;  %s3671_s14 = sand.u32 (!%p267_p9), 7, %s3665_s12  }
  0x2a   : > { %p292_p10 = scmp.eq.s32.totalorder (!%p267_p9), %s3671_s14, 0  ;;  %p2939_p11 = scmp.ne.s32.totalorder (!%p267_p9), %s3671_s14, 0 }
  0x30   : > { %295 = sbr.rel (%p2939_p11) target bundleno = 72 (0x48), region = 67  ;;  %s296_s16 = sshrl.u32 (!%p2939_p11), %s3665_s12, 3 }
  0x31   : > { %s297_s17 = sshrl.u32 (!%p2939_p11), %s296_s16, 4  ;;  %s3676_s18 = sand.u32 (!%p2939_p11), 15, %s296_s16  }
  0x32   : > { %s3061_s19 = sshll.u32 (!%p2939_p11), %s297_s17, 11  ;;  %p2946_p12 = scmp.le.s32.totalorder (!%p2939_p11), %s3676_s18, 0 }
  0x33   : > { %s448_s20 = sshra.s32 (!%p2939_p11), %s3061_s19, 4 }
  0x34   : > { %s3679_s21 = scalar_lea.vmem (!%p2939_p11), %s3663_s11, %s448_s20   ;;  %s3682_s22 = scalar_lea.vmem (!%p2939_p11), %s3667_s13, %s448_s20 [#allocation3]  }
  0x37   : > { %2860 = sbr.rel (%p2946_p12) target bundleno = 72 (0x48), region = 172  ;;  %s4616_s23 = smov (!%p2946_p12), %s3682_s22 }
  0x38   : > { %s4617_s24 = smov (!%p2946_p12), %s3679_s21  ;;  %s3691_s25 = smov (!%p2946_p12), 0  }
  0x39   : > { %s3536_s0 = smov (!%p2946_p12), 0  }
  0x3e LB: >> { %v464_v1 = vld [vmem:[%s3530_s24] sm:$0xff]  ;;  %v466_v2 = vld [vmem:[%s3530_s24 + $0x18] sm:$0xff]  ;;  %v468_v3 = vld [vmem:[%s3530_s24 + $0x30] sm:$0xff]  ;;  %s472_s16 = sadd.s32 1, %s3534_s25  ;;  %s458_s0 = sadd.s32 1, %s3538_s0   ;;  %s3538_s0 = sphi %s3536_s0, %s458_s0   ;;  %s3534_s25 = sphi %s3691_s25, %s4618_s25   ;;  %s3530_s24 = sphi %s4617_s24, %s477_s24   ;;  %s3526_s23 = sphi %s4616_s23, %s478_s23  }
  0x3f   : >> { %465 = vst [vmem:[%s3526_s23] sm:$0xff] %v464_v1  ;;  %467 = vst [vmem:[%s3526_s23 + $0x10] sm:$0xff] %v466_v2  ;;  %v470_v4 = vld [vmem:[%s3530_s24 + $0x48] sm:$0xff]  ;;  %p473_p13 = scmp.ge.s32.totalorder %s472_s16, %s3676_s18  ;;  %p457_p0 = scmp.ge.s32.totalorder %s458_s0, %s3676_s18 }
  0x40   : >> { %469 = vst [vmem:[%s3526_s23 + $0x20] sm:$0xff] %v468_v3  ;;  %471 = vst [vmem:[%s3526_s23 + $0x30] sm:$0xff] %v470_v4 }
  0x41   : >> { %s4655_s16 = smov (%p473_p13, %s472_s16), 0  ;;  %460 = sbr.rel (!%p457_p0) target bundleno = 62 (0x3e), region = 178 }
  0x42   : >> { %s2947_s17 = sshll.u32 %s4655_s16, 3  ;;  %s4618_s25 = smov %s4655_s16 }
  0x43   : >> { %s477_s24 = scalar_lea.vmem %s3679_s21, %s2947_s17   ;;  %s478_s23 = scalar_lea.vmem %s3682_s22, %s2947_s17 [#allocation3]  }
  0x48 PF: > { %481 = sbr.rel (%p292_p10) target bundleno = 102 (0x66), region = 85  ;;  %s483_s19 = ssub.s32 (!%p292_p10), %s3665_s12, %s3671_s14 }
  0x49   : > { %s487_s20 = sshrl.u32 (!%p292_p10), %s3665_s12, 3  ;;  %s3712_s25 = scalar_lea.vmem (!%p292_p10), %s3663_s11, %s483_s19 }
  0x4a   : > { %s3715_s17 = scalar_lea.vmem (!%p292_p10), %s3667_s13, %s483_s19 [#allocation3]  ;;  %s488_s0 = sshrl.u32 (!%p292_p10), %s487_s20, 4 }
  0x4b   : > { %s3717_s16 = sand.u32 (!%p292_p10), 15, %s487_s20   ;;  %s3063_s18 = sshll.u32 (!%p292_p10), %s488_s0, 11 }
  0x4c   : > { %s639_s21 = sshra.s32 (!%p292_p10), %s3063_s18, 4  ;;  %p2955_p1 = scmp.le.s32.totalorder (!%p292_p10), %s3717_s16, 0 }
  0x4d   : > { %s3720_s22 = scalar_lea.vmem (!%p292_p10), %s3663_s11, %s639_s21   ;;  %s3723_s23 = scalar_lea.vmem (!%p292_p10), %s3667_s13, %s639_s21 [#allocation3]  }
  0x4f   : > { %2888 = sbr.rel (%p2955_p1) target bundleno = 96 (0x60), region = 194  ;;  %s4619_s24 = smov (!%p2955_p1), %s3723_s23 }
  0x50   : > { %s4620_s10 = smov (!%p2955_p1), %s3720_s22  ;;  %s3732_s19 = smov (!%p2955_p1), 0  }
  0x51   : > { %s3552_s6 = smov (!%p2955_p1), 0  }
  0x56 LB: >> { %v655_v5 = vld [vmem:[%s3546_s10] sm:$0xff]  ;;  %v657_v6 = vld [vmem:[%s3546_s10 + $0x18] sm:$0xff]  ;;  %v659_v7 = vld [vmem:[%s3546_s10 + $0x30] sm:$0xff]  ;;  %s663_s20 = sadd.s32 1, %s3550_s19  ;;  %s649_s6 = sadd.s32 1, %s3554_s6   ;;  %s3554_s6 = sphi %s3552_s6, %s649_s6   ;;  %s3550_s19 = sphi %s3732_s19, %s4621_s19   ;;  %s3546_s10 = sphi %s4620_s10, %s668_s10   ;;  %s3542_s24 = sphi %s4619_s24, %s669_s24  }
  0x57   : >> { %656 = vst [vmem:[%s3542_s24] sm:$0xff] %v655_v5  ;;  %658 = vst [vmem:[%s3542_s24 + $0x10] sm:$0xff] %v657_v6  ;;  %v661_v8 = vld [vmem:[%s3546_s10 + $0x48] sm:$0xff]  ;;  %p664_p2 = scmp.ge.s32.totalorder %s663_s20, %s3717_s16  ;;  %p648_p3 = scmp.ge.s32.totalorder %s649_s6, %s3717_s16 }
  0x58   : >> { %660 = vst [vmem:[%s3542_s24 + $0x20] sm:$0xff] %v659_v7  ;;  %662 = vst [vmem:[%s3542_s24 + $0x30] sm:$0xff] %v661_v8 }
  0x59   : >> { %s4657_s20 = smov (%p664_p2, %s663_s20), 0  ;;  %651 = sbr.rel (!%p648_p3) target bundleno = 86 (0x56), region = 200 }
  0x5a   : >> { %s2956_s0 = sshll.u32 %s4657_s20, 3  ;;  %s4621_s19 = smov %s4657_s20 }
  0x5b   : >> { %s668_s10 = scalar_lea.vmem %s3720_s22, %s2956_s0   ;;  %s669_s24 = scalar_lea.vmem %s3723_s23, %s2956_s0 [#allocation3]  }
  0x60 PF: > { %s3556_s18 = smov 0  }
  0x61   : > { %s670_s21 = sshllo.u32 %s3556_s18, %s3671_s14 }
  0x62   : > { %v679_v9 = vld [vmem:[%s3712_s25] sm:%s670_s21]  ;;  %v681_v10 = vld [vmem:[%s3712_s25 + $0x18] sm:%s670_s21] }
  0x63   : > { %680 = vst [vmem:[%s3715_s17] sm:%s670_s21] %v679_v9  ;;  %682 = vst [vmem:[%s3715_s17 + $0x10] sm:%s670_s21] %v681_v10 }
  0x64   : > { %v683_v11 = vld [vmem:[%s3712_s25 + $0x30] sm:%s670_s21]  ;;  %v685_v12 = vld [vmem:[%s3712_s25 + $0x48] sm:%s670_s21] }
  0x65   : > { %684 = vst [vmem:[%s3715_s17 + $0x20] sm:%s670_s21] %v683_v11  ;;  %686 = vst [vmem:[%s3715_s17 + $0x30] sm:%s670_s21] %v685_v12 }
  0x66 PF: > { %p2958_p4 = scmp.ge.u32.totalorder %s3665_s12, 8 }
  0x67   : > { %s3557_s6 = smov (!%p2958_p4), 0  }
  0x68   : > { %273 = sbr.rel (%p2958_p4) target bundleno = 111 (0x6f), region = 56  ;;  %s274_s10 = sshllo.u32 (!%p2958_p4), %s3557_s6, %s3665_s12 }
  0x69   : > { %v283_v13 = vld [vmem:[%s3663_s11] sm:%s274_s10] (!%p2958_p4)  ;;  %v285_v14 = vld [vmem:[%s3663_s11 + $0x18] sm:%s274_s10] (!%p2958_p4) }
  0x6a   : > { %284 = vst [vmem:[%s3667_s13] sm:%s274_s10] (!%p2958_p4), %v283_v13  ;;  %286 = vst [vmem:[%s3667_s13 + $0x10] sm:%s274_s10] (!%p2958_p4), %v285_v14 }
  0x6b   : > { %v287_v15 = vld [vmem:[%s3663_s11 + $0x30] sm:%s274_s10] (!%p2958_p4)  ;;  %v289_v16 = vld [vmem:[%s3663_s11 + $0x48] sm:%s274_s10] (!%p2958_p4) }
  0x6c   : > { %288 = vst [vmem:[%s3667_s13 + $0x20] sm:%s274_s10] (!%p2958_p4), %v287_v15  ;;  %290 = vst [vmem:[%s3667_s13 + $0x30] sm:%s274_s10] (!%p2958_p4), %v289_v16 }
  0x6f PF: > { %p2959_p5 = scmp.ge.s32.totalorder %s3522_s9, 1  ;;  %p689_p6 = scmp.lt.s32.totalorder %s3522_s9, 5 }
  0x71   : > { %p690_p7 = pnand %p2959_p5, %p689_p6 }
  0x73   : > { %693 = sbr.rel (%p690_p7) target bundleno = 877 (0x36d), region = 110 }
  0x7a   : > { %v820_v17 = vld [vmem:[%s4597_s2] sm:$0xff]  ;;  %v822_v18 = vld [vmem:[%s4597_s2 + $0x10] sm:$0xff]  ;;  %s696_s11 = sand.u32 1, %s3498_s26   ;;  %v3558_v19 = vmov 0   ;;  %v821_v20 = vld [vmem:[%s4597_s2 + $0x8] sm:$0xff]  ;;  %vm1364_vm0 = vcmask 261120  }
  0x7b   : > { %3322 = vset.pattern.permute.xlu0 %v3558_v19  ;;  %3323 = vset.pattern.permute.xlu1 %v3558_v19  ;;  %s2960_s22 = sshll.u32 %s696_s11, 6  ;;  %v823_v21 = vld [vmem:[%s4597_s2 + $0x18] sm:$0xff]  ;;  %v824_v33 = vld [vmem:[%s4597_s2 + $0x20] sm:$0xff]  ;;  %v825_v35 = vld [vmem:[%s4597_s2 + $0x28] sm:$0xff]  ;;  %p735_p8 = scmp.lt.s32.totalorder %s3510_s29, 1 }
  0x7c   : > { %886 = vperm.xlu0 %3322, %v820_v17   ;;  %896 = vperm.xlu1 %3323, %v822_v18   ;;  %s698_s19 = scalar_lea.vmem [#allocation3], %s2960_s22  ;;  %v3324_v36 = vld [vmem:[%s4596_s1] sm:$0xff]   ;;  %v826_v37 = vld [vmem:[%s4597_s2 + $0x30] sm:$0xff]  ;;  %v827_v38 = vld [vmem:[%s4597_s2 + $0x38] sm:$0xff]  ;;  %p737_p9 = scmp.lt.s32.totalorder %s3506_s28, 1 }
  0x7d   : > { %v745_v22 = vld [vmem:[%s698_s19 + $0x8] sm:$0xff]  ;;  %v747_v23 = vld [vmem:[%s698_s19 + $0x18] sm:$0xff]  ;;  %v744_v24 = vld [vmem:[%s698_s19] sm:$0xff]  ;;  %1493 = vmatprep.mubr.bf16.mxu0 %v3558_v19  ;;  %1733 = vmatprep.mubr.bf16.mxu1 %v3558_v19  ;;  %s4659_s29 = smov (!%p735_p8, %s3510_s29), 1 }
  0x7e   : > { %v753_v25 = vpack.c.bf16 %v747_v23, %v745_v22  ;;  %v746_v26 = vld [vmem:[%s698_s19 + $0x10] sm:$0xff]  ;;  %v749_v27 = vld [vmem:[%s698_s19 + $0x28] sm:$0xff]  ;;  %v751_v28 = vld [vmem:[%s698_s19 + $0x38] sm:$0xff]  ;;  %s4661_s28 = smov (!%p737_p9, %s3506_s28), 1  ;;  %s2962_s14 = sshll.u32 %s4659_s29, 2 }
  0x7f   : > { %v752_v29 = vpack.c.bf16 %v746_v26, %v744_v24  ;;  %v755_v30 = vpack.c.bf16 %v751_v28, %v749_v27  ;;  %v748_v31 = vld [vmem:[%s698_s19 + $0x20] sm:$0xff]  ;;  %v750_v32 = vld [vmem:[%s698_s19 + $0x30] sm:$0xff]  ;;  %s2961_s10 = sshll.u32 %s4661_s28, 1 }
  0x80   : > { %891 = vperm.xlu0 %3322, %v821_v20   ;;  %1461 = vmatprep.subr.bf16.mxu0 %v753_v25  ;;  %v754_v34 = vpack.c.bf16 %v750_v32, %v748_v31  ;;  %v828_v39 = vld [vmem:[%s4597_s2 + $0x40] sm:$0xff]  ;;  %v829_v40 = vld [vmem:[%s4597_s2 + $0x48] sm:$0xff]  ;;  %v830_v43 = vld [vmem:[%s4597_s2 + $0x50] sm:$0xff]  ;;  %s741_s12 = sadd.s32 %s2962_s14, %s2961_s10 }
  0x81   : > { %1462 = vmatpush1.bf16.msra.mxu0 %v752_v29  ;;  %901 = vperm.xlu1 %3323, %v823_v21   ;;  %v3329_v41 = vld [vmem:[%s4596_s1 + $0xc0] sm:$0xff]   ;;  %v3325_v42 = vld [vmem:[%s4596_s1 + $0x8] sm:$0xff]   ;;  %v831_v44 = vld [vmem:[%s4597_s2 + $0x58] sm:$0xff]  ;;  %s742_s11 = scalar_lea.vmem %s4602_s7, %s741_s12 }
  0x82   : > { %1463 = vmatprep.subr.bf16.mxu0 %v755_v30  ;;  %3065 = vmatprep.subr.bf16.mxu1 %v753_v25  ;;  %v3331_v45 = vld [vmem:[%s4596_s1 + $0xc8] sm:$0xff]   ;;  %v832_v46 = vld [vmem:[%s4597_s2 + $0x60] sm:$0xff]  ;;  %v3326_v48 = vld [vmem:[%s4596_s1 + $0x10] sm:$0xff]  }
  0x83   : > { %3067 = vmatpush1.bf16.msra.mxu1 %v752_v29  ;;  %v833_v47 = vld [vmem:[%s4597_s2 + $0x68] sm:$0xff]  ;;  %v834_v49 = vld [vmem:[%s4597_s2 + $0x70] sm:$0xff]  ;;  %v835_v50 = vld [vmem:[%s4597_s2 + $0x78] sm:$0xff] }
  0x84   : > { %906 = vperm.xlu0 %3322, %v824_v33   ;;  %3066 = vmatprep.subr.bf16.mxu1 %v755_v30  ;;  %v3333_v51 = vld [vmem:[%s4596_s1 + $0xd0] sm:$0xff]   ;;  %v836_v52 = vld [vmem:[%s4597_s2 + $0x80] sm:$0xff]  ;;  %v837_v53 = vld [vmem:[%s4597_s2 + $0x88] sm:$0xff] }
  0x85   : > { %1464 = vmatpush1.bf16.msra.mxu0 %v754_v34  ;;  %911 = vperm.xlu1 %3323, %v825_v35   ;;  %v3327_v54 = vld [vmem:[%s4596_s1 + $0x18] sm:$0xff]   ;;  %v838_v55 = vld [vmem:[%s4597_s2 + $0x90] sm:$0xff]  ;;  %v840_v58 = vld [vmem:[%s4597_s2 + $0xa0] sm:$0xff] }
  0x86   : > { %v839_v56 = vld [vmem:[%s4597_s2 + $0x98] sm:$0xff]  ;;  %v841_v59 = vld [vmem:[%s4597_s2 + $0xa8] sm:$0xff]  ;;  %v3328_v60 = vld [vmem:[%s4596_s1 + $0x20] sm:$0xff]  }
  0x87   : > { %3068 = vmatpush1.bf16.msra.mxu1 %v754_v34  ;;  %v3335_v57 = vld [vmem:[%s4596_s1 + $0xd8] sm:$0xff]   ;;  %v842_v61 = vld [vmem:[%s4597_s2 + $0xb0] sm:$0xff]  ;;  %v3337_v63 = vld [vmem:[%s4596_s1 + $0xe0] sm:$0xff]  }
  0x88   : > { %916 = vperm.xlu0 %3322, %v826_v37   ;;  %2995 = vmatmul.mubr.msk.bf16.vlgmr.msra.gmra.mrb[0].mxu0 %vm1364_vm0, %v3324_v36  ;;  %v843_v62 = vld [vmem:[%s4597_s2 + $0xb8] sm:$0xff]  ;;  %v844_v0 = vld [vmem:[%s4597_s2 + $0xc0] sm:$0xff]  ;;  %v845_v1 = vld [vmem:[%s4597_s2 + $0xc8] sm:$0xff] }
  0x89   : > { %921 = vperm.xlu1 %3323, %v827_v38   ;;  %1503 = vmatprep.mubr.bf16.mxu0 %v3558_v19  ;;  %v3330_v2 = vld [vmem:[%s4596_s1 + $0x28] sm:$0xff]   ;;  %v846_v3 = vld [vmem:[%s4597_s2 + $0xd0] sm:$0xff]  ;;  %v847_v4 = vld [vmem:[%s4597_s2 + $0xd8] sm:$0xff] }
  0x8a   : > { %3019 = vmatmul.mubr.msk.bf16.vlgmr.msra.gmra.mrb[0].mxu1 %vm1364_vm0, %v3329_v41  ;;  %v3339_v5 = vld [vmem:[%s4596_s1 + $0xe8] sm:$0xff]   ;;  %v848_v6 = vld [vmem:[%s4597_s2 + $0xe0] sm:$0xff]  ;;  %v3332_v8 = vld [vmem:[%s4596_s1 + $0x30] sm:$0xff]  }
  0x8b   : > { %1743 = vmatprep.mubr.bf16.mxu1 %v3558_v19  ;;  %v849_v7 = vld [vmem:[%s4597_s2 + $0xe8] sm:$0xff]  ;;  %v850_v9 = vld [vmem:[%s4597_s2 + $0xf0] sm:$0xff]  ;;  %v851_v10 = vld [vmem:[%s4597_s2 + $0xf8] sm:$0xff] }
  0x8c   : > { %926 = vperm.xlu0 %3322, %v828_v39   ;;  %v3341_v11 = vld [vmem:[%s4596_s1 + $0xf0] sm:$0xff]   ;;  %v852_v12 = vld [vmem:[%s4597_s2 + $0x100] sm:$0xff]  ;;  %v853_v13 = vld [vmem:[%s4597_s2 + $0x108] sm:$0xff] }
  0x8d   : > { %931 = vperm.xlu1 %3323, %v829_v40   ;;  %v854_v14 = vld [vmem:[%s4597_s2 + $0x110] sm:$0xff]  ;;  %v3334_v15 = vld [vmem:[%s4596_s1 + $0x38] sm:$0xff]   ;;  %v856_v18 = vld [vmem:[%s4597_s2 + $0x120] sm:$0xff] }
  0x8e   : > { %v855_v16 = vld [vmem:[%s4597_s2 + $0x118] sm:$0xff]  ;;  %v857_v20 = vld [vmem:[%s4597_s2 + $0x128] sm:$0xff]  ;;  %v3336_v21 = vld [vmem:[%s4596_s1 + $0x40] sm:$0xff]  }
  0x8f   : > { %v3343_v17 = vld [vmem:[%s4596_s1 + $0xf8] sm:$0xff]   ;;  %v858_v22 = vld [vmem:[%s4597_s2 + $0x130] sm:$0xff]  ;;  %v860_v24 = vld [vmem:[%s4597_s2 + $0x140] sm:$0xff] }
  0x90   : > { %936 = vperm.xlu0 %3322, %v830_v43   ;;  %2996 = vmatmul.mubr.msk.bf16.gmra.mrb[4].mxu0 %vm1364_vm0, %v3325_v42  ;;  %v859_v23 = vld [vmem:[%s4597_s2 + $0x138] sm:$0xff]  ;;  %v861_v25 = vld [vmem:[%s4597_s2 + $0x148] sm:$0xff]  ;;  %v862_v27 = vld [vmem:[%s4597_s2 + $0x150] sm:$0xff] }
  0x91   : > { %941 = vperm.xlu1 %3323, %v831_v44   ;;  %1513 = vmatprep.mubr.bf16.mxu0 %v3558_v19  ;;  %v3338_v26 = vld [vmem:[%s4596_s1 + $0x48] sm:$0xff]   ;;  %v863_v28 = vld [vmem:[%s4597_s2 + $0x158] sm:$0xff]  ;;  %v864_v29 = vld [vmem:[%s4597_s2 + $0x160] sm:$0xff] }
  0x92   : > { %3020 = vmatmul.mubr.msk.bf16.gmra.mrb[4].mxu1 %vm1364_vm0, %v3331_v45  ;;  %v865_v30 = vld [vmem:[%s4597_s2 + $0x168] sm:$0xff]  ;;  %v3340_v31 = vld [vmem:[%s4596_s1 + $0x50] sm:$0xff]   ;;  %v867_v33 = vld [vmem:[%s4597_s2 + $0x178] sm:$0xff] }
  0x93   : > { %1753 = vmatprep.mubr.bf16.mxu1 %v3558_v19  ;;  %v866_v32 = vld [vmem:[%s4597_s2 + $0x170] sm:$0xff]  ;;  %v868_v34 = vld [vmem:[%s4597_s2 + $0x180] sm:$0xff]  ;;  %v869_v35 = vld [vmem:[%s4597_s2 + $0x188] sm:$0xff] }
  0x94   : > { %946 = vperm.xlu0 %3322, %v832_v46   ;;  %v3342_v36 = vld [vmem:[%s4596_s1 + $0x58] sm:$0xff]   ;;  %v870_v37 = vld [vmem:[%s4597_s2 + $0x190] sm:$0xff]  ;;  %v872_v39 = vld [vmem:[%s4597_s2 + $0x1a0] sm:$0xff] }
  0x95   : > { %951 = vperm.xlu1 %3323, %v833_v47   ;;  %v871_v38 = vld [vmem:[%s4597_s2 + $0x198] sm:$0xff]  ;;  %v873_v40 = vld [vmem:[%s4597_s2 + $0x1a8] sm:$0xff]  ;;  %v3344_v41 = vld [vmem:[%s4596_s1 + $0x60] sm:$0xff]  }
  0x96   : > { %v874_v42 = vld [vmem:[%s4597_s2 + $0x1b0] sm:$0xff]  ;;  %v875_v43 = vld [vmem:[%s4597_s2 + $0x1b8] sm:$0xff]  ;;  %v876_v44 = vld [vmem:[%s4597_s2 + $0x1c0] sm:$0xff] }
  0x97   : > { %v877_v45 = vld [vmem:[%s4597_s2 + $0x1c8] sm:$0xff]  ;;  %v878_v47 = vld [vmem:[%s4597_s2 + $0x1d0] sm:$0xff] }
  0x98   : > { %956 = vperm.xlu0 %3322, %v834_v49   ;;  %2997 = vmatmul.mubr.msk.bf16.gmra.mrb[8].mxu0 %vm1364_vm0, %v3326_v48  ;;  %v3345_v46 = vld [vmem:[%s4596_s1 + $0x68] sm:$0xff]   ;;  %v879_v48 = vld [vmem:[%s4597_s2 + $0x1d8] sm:$0xff]  ;;  %v880_v49 = vld [vmem:[%s4597_s2 + $0x1e0] sm:$0xff] }
  0x99   : > { %961 = vperm.xlu1 %3323, %v835_v50   ;;  %1523 = vmatprep.mubr.bf16.mxu0 %v3558_v19  ;;  %v881_v50 = vld [vmem:[%s4597_s2 + $0x1e8] sm:$0xff] }
  0x9a   : > { %3021 = vmatmul.mubr.msk.bf16.gmra.mrb[8].mxu1 %vm1364_vm0, %v3333_v51  ;;  %v3346_v51 = vld [vmem:[%s4596_s1 + $0x70] sm:$0xff]  }
  0x9b   : > { %1763 = vmatprep.mubr.bf16.mxu1 %v3558_v19 }
  0x9c   : > { %966 = vperm.xlu0 %3322, %v836_v52   ;;  %v882_v52 = vld [vmem:[%s4597_s2 + $0x1f0] sm:$0xff] }
  0x9d   : > { %971 = vperm.xlu1 %3323, %v837_v53   ;;  %v883_v53 = vld [vmem:[%s4597_s2 + $0x1f8] sm:$0xff] }
  0xa0   : > { %976 = vperm.xlu0 %3322, %v838_v55   ;;  %2998 = vmatmul.mubr.msk.bf16.gmra.mrb[12].mxu0 %vm1364_vm0, %v3327_v54  ;;  %v2038_v54 = vld [vmem:[%s4599_s4] sm:$0xff]  ;;  %v2039_v55 = vld [vmem:[%s4599_s4 + $0x8] sm:$0xff] }
  0xa1   : > { %981 = vperm.xlu1 %3323, %v839_v56   ;;  %1533 = vmatprep.mubr.bf16.mxu0 %v3558_v19 }
  0xa2   : > { %3022 = vmatmul.mubr.msk.bf16.gmra.mrb[12].mxu1 %vm1364_vm0, %v3335_v57 }
  0xa3   : > { %1773 = vmatprep.mubr.bf16.mxu1 %v3558_v19 }
  0xa4   : > { %986 = vperm.xlu0 %3322, %v840_v58   ;;  %v3347_v58 = vld [vmem:[%s4596_s1 + $0x78] sm:$0xff]  }
  0xa5   : > { %991 = vperm.xlu1 %3323, %v841_v59   ;;  %v2040_v59 = vld [vmem:[%s4599_s4 + $0x10] sm:$0xff] }
  0xa8   : > { %996 = vperm.xlu0 %3322, %v842_v61   ;;  %2999 = vmatmul.mubr.msk.bf16.gmra.mrb[16].mxu0 %vm1364_vm0, %v3328_v60  ;;  %v2041_v60 = vld [vmem:[%s4599_s4 + $0x18] sm:$0xff] }
  0xa9   : > { %1001 = vperm.xlu1 %3323, %v843_v62   ;;  %1543 = vmatprep.mubr.bf16.mxu0 %v3558_v19 }
  0xaa   : > { %3023 = vmatmul.mubr.msk.bf16.gmra.mrb[16].mxu1 %vm1364_vm0, %v3337_v63  ;;  %v2552_v63 = vld [vmem:[%s4600_s5] sm:$0xff] }
  0xab   : > { %1783 = vmatprep.mubr.bf16.mxu1 %v3558_v19 }
  0xac   : > { %1006 = vperm.xlu0 %3322, %v844_v0   ;;  %v2553_v0 = vld [vmem:[%s4600_s5 + $0x8] sm:$0xff] }
  0xad   : > { %1011 = vperm.xlu1 %3323, %v845_v1  }
  0xb0   : > { %1016 = vperm.xlu0 %3322, %v846_v3   ;;  %3000 = vmatmul.mubr.msk.bf16.gmra.mrb[20].mxu0 %vm1364_vm0, %v3330_v2  ;;  %v3348_v3 = vld [vmem:[%s4596_s1 + $0x80] sm:$0xff]  }
  0xb1   : > { %1021 = vperm.xlu1 %3323, %v847_v4   ;;  %1553 = vmatprep.mubr.bf16.mxu0 %v3558_v19  ;;  %v2042_v4 = vld [vmem:[%s4599_s4 + $0x20] sm:$0xff] }
  0xb2   : > { %3024 = vmatmul.mubr.msk.bf16.gmra.mrb[20].mxu1 %vm1364_vm0, %v3339_v5  ;;  %v2554_v5 = vld [vmem:[%s4600_s5 + $0x10] sm:$0xff] }
  0xb3   : > { %1793 = vmatprep.mubr.bf16.mxu1 %v3558_v19 }
  0xb4   : > { %1026 = vperm.xlu0 %3322, %v848_v6  }
  0xb5   : > { %1031 = vperm.xlu1 %3323, %v849_v7  }
  0xb8   : > { %1036 = vperm.xlu0 %3322, %v850_v9   ;;  %3001 = vmatmul.mubr.msk.bf16.gmra.mrb[24].mxu0 %vm1364_vm0, %v3332_v8  ;;  %v2043_v8 = vld [vmem:[%s4599_s4 + $0x28] sm:$0xff]  ;;  %v2555_v9 = vld [vmem:[%s4600_s5 + $0x18] sm:$0xff] }
  0xb9   : > { %1041 = vperm.xlu1 %3323, %v851_v10   ;;  %1563 = vmatprep.mubr.bf16.mxu0 %v3558_v19 }
  0xba   : > { %3025 = vmatmul.mubr.msk.bf16.gmra.mrb[24].mxu1 %vm1364_vm0, %v3341_v11 }
  0xbb   : > { %1803 = vmatprep.mubr.bf16.mxu1 %v3558_v19 }
  0xbc   : > { %1046 = vperm.xlu0 %3322, %v852_v12   ;;  %v3349_v12 = vld [vmem:[%s4596_s1 + $0x88] sm:$0xff]  }
  0xbd   : > { %1051 = vperm.xlu1 %3323, %v853_v13   ;;  %v2044_v13 = vld [vmem:[%s4599_s4 + $0x30] sm:$0xff] }
  0xc0   : > { %1056 = vperm.xlu0 %3322, %v854_v14   ;;  %3002 = vmatmul.mubr.msk.bf16.gmra.mrb[28].mxu0 %vm1364_vm0, %v3334_v15  ;;  %v2556_v14 = vld [vmem:[%s4600_s5 + $0x20] sm:$0xff] }
  0xc1   : > { %1061 = vperm.xlu1 %3323, %v855_v16   ;;  %1573 = vmatprep.mubr.bf16.mxu0 %v3558_v19 }
  0xc2   : > { %3026 = vmatmul.mubr.msk.bf16.gmra.mrb[28].mxu1 %vm1364_vm0, %v3343_v17  ;;  %v2045_v17 = vld [vmem:[%s4599_s4 + $0x38] sm:$0xff] }
  0xc4   : > { %1066 = vperm.xlu0 %3322, %v856_v18   ;;  %v2557_v18 = vld [vmem:[%s4600_s5 + $0x28] sm:$0xff] }
  0xc5   : > { %1071 = vperm.xlu1 %3323, %v857_v20  }
  0xc8   : > { %1076 = vperm.xlu0 %3322, %v858_v22   ;;  %3003 = vmatmul.mubr.msk.bf16.gmra.mrb[32].mxu0 %vm1364_vm0, %v3336_v21  ;;  %v3350_v22 = vld [vmem:[%s4596_s1 + $0x90] sm:$0xff]  }
  0xc9   : > { %1081 = vperm.xlu1 %3323, %v859_v23   ;;  %1583 = vmatprep.mubr.bf16.mxu0 %v3558_v19  ;;  %v2046_v23 = vld [vmem:[%s4599_s4 + $0x40] sm:$0xff] }
  0xcc   : > { %1086 = vperm.xlu0 %3322, %v860_v24   ;;  %v2558_v24 = vld [vmem:[%s4600_s5 + $0x30] sm:$0xff] }
  0xcd   : > { %1091 = vperm.xlu1 %3323, %v861_v25  }
  0xd0   : > { %1096 = vperm.xlu0 %3322, %v862_v27   ;;  %3004 = vmatmul.mubr.msk.bf16.gmra.mrb[36].mxu0 %vm1364_vm0, %v3338_v26  ;;  %v2047_v27 = vld [vmem:[%s4599_s4 + $0x48] sm:$0xff] }
  0xd1   : > { %1101 = vperm.xlu1 %3323, %v863_v28   ;;  %1593 = vmatprep.mubr.bf16.mxu0 %v3558_v19  ;;  %v2559_v28 = vld [vmem:[%s4600_s5 + $0x38] sm:$0xff] }
  0xd4   : > { %1106 = vperm.xlu0 %3322, %v864_v29  }
  0xd5   : > { %1111 = vperm.xlu1 %3323, %v865_v30  }
  0xd8   : > { %1116 = vperm.xlu0 %3322, %v866_v32   ;;  %3005 = vmatmul.mubr.msk.bf16.gmra.mrb[40].mxu0 %vm1364_vm0, %v3340_v31  ;;  %v3351_v31 = vld [vmem:[%s4596_s1 + $0x98] sm:$0xff]   ;;  %v2048_v32 = vld [vmem:[%s4599_s4 + $0x50] sm:$0xff] }
  0xd9   : > { %1121 = vperm.xlu1 %3323, %v867_v33   ;;  %1603 = vmatprep.mubr.bf16.mxu0 %v3558_v19  ;;  %v2560_v33 = vld [vmem:[%s4600_s5 + $0x40] sm:$0xff] }
  0xdc   : > { %1126 = vperm.xlu0 %3322, %v868_v34  }
  0xdd   : > { %1131 = vperm.xlu1 %3323, %v869_v35  }
  0xe0   : > { %1136 = vperm.xlu0 %3322, %v870_v37   ;;  %3006 = vmatmul.mubr.msk.bf16.gmra.mrb[44].mxu0 %vm1364_vm0, %v3342_v36  ;;  %v2049_v36 = vld [vmem:[%s4599_s4 + $0x58] sm:$0xff]  ;;  %v2561_v37 = vld [vmem:[%s4600_s5 + $0x48] sm:$0xff] }
  0xe1   : > { %1141 = vperm.xlu1 %3323, %v871_v38   ;;  %1613 = vmatprep.mubr.bf16.mxu0 %v3558_v19 }
  0xe4   : > { %1146 = vperm.xlu0 %3322, %v872_v39  }
  0xe5   : > { %1151 = vperm.xlu1 %3323, %v873_v40   ;;  %v3352_v40 = vld [vmem:[%s4596_s1 + $0xa0] sm:$0xff]  }
  0xe8   : > { %1156 = vperm.xlu0 %3322, %v874_v42   ;;  %3007 = vmatmul.mubr.msk.bf16.gmra.mrb[48].mxu0 %vm1364_vm0, %v3344_v41  ;;  %v2050_v41 = vld [vmem:[%s4599_s4 + $0x60] sm:$0xff]  ;;  %v2562_v42 = vld [vmem:[%s4600_s5 + $0x50] sm:$0xff] }
  0xe9   : > { %1161 = vperm.xlu1 %3323, %v875_v43   ;;  %1623 = vmatprep.mubr.bf16.mxu0 %v3558_v19 }
  0xec   : > { %1166 = vperm.xlu0 %3322, %v876_v44  }
  0xed   : > { %1171 = vperm.xlu1 %3323, %v877_v45   ;;  %v2051_v45 = vld [vmem:[%s4599_s4 + $0x68] sm:$0xff] }
  0xf0   : > { %1176 = vperm.xlu0 %3322, %v878_v47   ;;  %3008 = vmatmul.mubr.msk.bf16.gmra.mrb[52].mxu0 %vm1364_vm0, %v3345_v46  ;;  %v2563_v46 = vld [vmem:[%s4600_s5 + $0x58] sm:$0xff] }
  0xf1   : > { %1181 = vperm.xlu1 %3323, %v879_v48   ;;  %1633 = vmatprep.mubr.bf16.mxu0 %v3558_v19 }
  0xf4   : > { %1186 = vperm.xlu0 %3322, %v880_v49   ;;  %v3353_v49 = vld [vmem:[%s4596_s1 + $0xa8] sm:$0xff]  }
  0xf5   : > { %1191 = vperm.xlu1 %3323, %v881_v50   ;;  %v2052_v50 = vld [vmem:[%s4599_s4 + $0x70] sm:$0xff] }
  0xf8   : > { %1196 = vperm.xlu0 %3322, %v882_v52   ;;  %3009 = vmatmul.mubr.msk.bf16.gmra.mrb[56].mxu0 %vm1364_vm0, %v3346_v51  ;;  %v2564_v51 = vld [vmem:[%s4600_s5 + $0x60] sm:$0xff] }
  0xf9   : > { %1201 = vperm.xlu1 %3323, %v883_v53   ;;  %1643 = vmatprep.mubr.bf16.mxu0 %v3558_v19 }
  0xfb   : > { %v4085_v56 = vpop.permute.xlu0 %886  ;;  %v4087_v57 = vpop.permute.xlu1 %896 }
  0xfc   : > { %2056 = vperm.xlu0 %3322, %v2038_v54   ;;  %v2053_v54 = vld [vmem:[%s4599_s4 + $0x78] sm:$0xff] }
  0xfd   : > { %2061 = vperm.xlu1 %3323, %v2039_v55   ;;  %v2565_v55 = vld [vmem:[%s4600_s5 + $0x68] sm:$0xff] }
  0xff   : > { %v4098_v61 = vpop.permute.xlu0 %891 }
 0x100   : > { %2066 = vperm.xlu0 %3322, %v2040_v59   ;;  %3010 = vmatmul.mubr.msk.bf16.gmra.mrb[60].mxu0 %vm1364_vm0, %v3347_v58  ;;  %v4101_v62 = vpop.permute.xlu1 %901 }
 0x101   : > { %2071 = vperm.xlu1 %3323, %v2041_v60   ;;  %1653 = vmatprep.mubr.bf16.mxu0 %v3558_v19  ;;  %v3354_v60 = vld [vmem:[%s4596_s1 + $0xb0] sm:$0xff]  }
 0x103   : > { %v4110_v1 = vpop.permute.xlu0 %906 }
 0x104   : > { %2570 = vperm.xlu0 %3322, %v2552_v63   ;;  %v4112_v2 = vpop.permute.xlu1 %911  ;;  %v2566_v63 = vld [vmem:[%s4600_s5 + $0x70] sm:$0xff] }
 0x105   : > { %2575 = vperm.xlu1 %3323, %v2553_v0   ;;  %v2567_v0 = vld [vmem:[%s4600_s5 + $0x78] sm:$0xff] }
 0x107   : > { %v4123_v6 = vpop.permute.xlu0 %916 }
 0x108   : > { %2076 = vperm.xlu0 %3322, %v2042_v4   ;;  %3011 = vmatmul.mubr.msk.bf16.gmra.mrb[64].mxu0 %vm1364_vm0, %v3348_v3  ;;  %v4126_v7 = vpop.permute.xlu1 %921 }
 0x109   : > { %2580 = vperm.xlu1 %3323, %v2554_v5   ;;  %1663 = vmatprep.mubr.bf16.mxu0 %v3558_v19  ;;  %v2722_v5 = vld [vmem:[#allocation2] sm:$0x1] }
 0x10b   : > { %v4135_v10 = vpop.permute.xlu0 %926 }
 0x10c   : > { %2081 = vperm.xlu0 %3322, %v2043_v8   ;;  %v4137_v11 = vpop.permute.xlu1 %931 }
 0x10d   : > { %2585 = vperm.xlu1 %3323, %v2555_v9  }
 0x10f   : > { %v4148_v15 = vpop.permute.xlu0 %936 }
 0x110   : > { %2086 = vperm.xlu0 %3322, %v2044_v13   ;;  %3012 = vmatmul.mubr.msk.bf16.gmra.mrb[68].mxu0 %vm1364_vm0, %v3349_v12  ;;  %v4151_v16 = vpop.permute.xlu1 %941  ;;  %v3355_v12 = vld [vmem:[%s4596_s1 + $0xb8] sm:$0xff]  }
 0x111   : > { %2590 = vperm.xlu1 %3323, %v2556_v14   ;;  %1673 = vmatprep.mubr.bf16.mxu0 %v3558_v19 }
 0x113   : > { %v4160_v20 = vpop.permute.xlu0 %946 }
 0x114   : > { %2091 = vperm.xlu0 %3322, %v2045_v17   ;;  %v4162_v21 = vpop.permute.xlu1 %951 }
 0x115   : > { %2595 = vperm.xlu1 %3323, %v2557_v18  }
 0x117   : > { %v4173_v25 = vpop.permute.xlu0 %956 }
 0x118   : > { %2096 = vperm.xlu0 %3322, %v2046_v23   ;;  %3013 = vmatmul.mubr.msk.bf16.gmra.mrb[72].mxu0 %vm1364_vm0, %v3350_v22  ;;  %v4176_v26 = vpop.permute.xlu1 %961 }
 0x119   : > { %2600 = vperm.xlu1 %3323, %v2558_v24   ;;  %1683 = vmatprep.mubr.bf16.mxu0 %v3558_v19 }
 0x11b   : > { %v4185_v29 = vpop.permute.xlu0 %966 }
 0x11c   : > { %2101 = vperm.xlu0 %3322, %v2047_v27   ;;  %v4187_v30 = vpop.permute.xlu1 %971 }
 0x11d   : > { %2605 = vperm.xlu1 %3323, %v2559_v28  }
 0x11f   : > { %v4198_v34 = vpop.permute.xlu0 %976 }
 0x120   : > { %2106 = vperm.xlu0 %3322, %v2048_v32   ;;  %3014 = vmatmul.mubr.msk.bf16.gmra.mrb[76].mxu0 %vm1364_vm0, %v3351_v31  ;;  %v4201_v35 = vpop.permute.xlu1 %981 }
 0x121   : > { %2610 = vperm.xlu1 %3323, %v2560_v33   ;;  %1693 = vmatprep.mubr.bf16.mxu0 %v3558_v19 }
 0x123   : > { %v4210_v38 = vpop.permute.xlu0 %986 }
 0x124   : > { %2111 = vperm.xlu0 %3322, %v2049_v36   ;;  %v4212_v39 = vpop.permute.xlu1 %991 }
 0x125   : > { %2615 = vperm.xlu1 %3323, %v2561_v37  }
 0x127   : > { %v4223_v43 = vpop.permute.xlu0 %996 }
 0x128   : > { %2116 = vperm.xlu0 %3322, %v2050_v41   ;;  %3015 = vmatmul.mubr.msk.bf16.gmra.mrb[80].mxu0 %vm1364_vm0, %v3352_v40  ;;  %v4226_v44 = vpop.permute.xlu1 %1001 }
 0x129   : > { %2620 = vperm.xlu1 %3323, %v2562_v42   ;;  %1703 = vmatprep.mubr.bf16.mxu0 %v3558_v19 }
 0x12b   : > { %v4235_v47 = vpop.permute.xlu0 %1006 }
 0x12c   : > { %2121 = vperm.xlu0 %3322, %v2051_v45   ;;  %v4237_v48 = vpop.permute.xlu1 %1011 }
 0x12d   : > { %2625 = vperm.xlu1 %3323, %v2563_v46  }
 0x12f   : > { %v4248_v52 = vpop.permute.xlu0 %1016 }
 0x130   : > { %2126 = vperm.xlu0 %3322, %v2052_v50   ;;  %3016 = vmatmul.mubr.msk.bf16.gmra.mrb[84].mxu0 %vm1364_vm0, %v3353_v49  ;;  %v4251_v53 = vpop.permute.xlu1 %1021 }
 0x131   : > { %2630 = vperm.xlu1 %3323, %v2564_v51   ;;  %1713 = vmatprep.mubr.bf16.mxu0 %v3558_v19 }
 0x133   : > { %v4260_v58 = vpop.permute.xlu0 %1026 }
 0x134   : > { %2131 = vperm.xlu0 %3322, %v2053_v54   ;;  %v4262_v59 = vpop.permute.xlu1 %1031 }
 0x135   : > { %2635 = vperm.xlu1 %3323, %v2565_v55  }
 0x137   : > { %v4273_v3 = vpop.permute.xlu0 %1036 }
 0x138   : > { %2640 = vperm.xlu0 %3322, %v2566_v63   ;;  %3017 = vmatmul.mubr.msk.bf16.gmra.mrb[88].mxu0 %vm1364_vm0, %v3354_v60  ;;  %v4276_v4 = vpop.permute.xlu1 %1041 }
 0x139   : > { %2645 = vperm.xlu1 %3323, %v2567_v0   ;;  %1723 = vmatprep.mubr.bf16.mxu0 %v3558_v19 }
 0x13b   : > { %v4279_v8 = vpop.permute.xlu0 %1046 }
 0x13c   : > { %2725 = vperm.xlu0 %3322, %v2722_v5   ;;  %v4281_v9 = vpop.permute.xlu1 %1051 }
 0x13f   : > { %v4286_v13 = vpop.permute.xlu0 %1056 }
 0x140   : > { %3018 = vmatmul.mubr.msk.bf16.gmra.mrb[92].mxu0 %vm1364_vm0, %v3355_v12  ;;  %v4289_v14 = vpop.permute.xlu1 %1061 }
 0x143   : > { %v4291_v17 = vpop.permute.xlu0 %1066 }
 0x144   : > { %v4293_v18 = vpop.permute.xlu1 %1071 }
 0x147   : > { %v4295_v19 = vpop.permute.xlu0 %1076 }
 0x148   : > { %v4297_v22 = vpop.permute.xlu1 %1081 }
 0x14b   : > { %v4299_v23 = vpop.permute.xlu0 %1086 }
 0x14c   : > { %v4301_v24 = vpop.permute.xlu1 %1091 }
 0x14d   : > { %4622 = vst [vmem:[#allocation6_spill] sm:$0xff] %v4301_v24 }
 0x14f   : > { %v4303_v27 = vpop.permute.xlu0 %1096 }
 0x150   : > { %4623 = vst [vmem:[#allocation7_spill] sm:$0xff] %v4303_v27  ;;  %v4305_v28 = vpop.permute.xlu1 %1101 }
 0x151   : > { %4624 = vst [vmem:[#allocation8_spill] sm:$0xff] %v4305_v28 }
 0x153   : > { %v4307_v31 = vpop.permute.xlu0 %1106 }
 0x154   : > { %4625 = vst [vmem:[#allocation9_spill] sm:$0xff] %v4307_v31  ;;  %v4309_v32 = vpop.permute.xlu1 %1111 }
 0x155   : > { %4626 = vst [vmem:[#allocation10_spill] sm:$0xff] %v4309_v32 }
 0x157   : > { %v4311_v33 = vpop.permute.xlu0 %1116 }
 0x158   : > { %4627 = vst [vmem:[#allocation11_spill] sm:$0xff] %v4311_v33  ;;  %v4313_v36 = vpop.permute.xlu1 %1121 }
 0x159   : > { %4628 = vst [vmem:[#allocation12_spill] sm:$0xff] %v4313_v36 }
 0x15b   : > { %v1495_v37 = vpop.f32.mrb[0].mxu0  ;;  %v1127_v50 = vpop.permute.xlu0 %1126 }
 0x15c   : > { %v1496_v40 = vadd.f32 %v1495_v37, %v4085_v56  ;;  %v1497_v41 = vpop.f32.mrb[1].mxu0  ;;  %v1132_v12 = vpop.permute.xlu1 %1131 }
 0x15d   : > { %v1498_v42 = vadd.f32 %v1497_v41, %v4085_v56  ;;  %v1499_v45 = vpop.f32.mrb[2].mxu0  ;;  %v1735_v54 = vpop.f32.mrb[0].mxu1 }
 0x15e   : > { %v1500_v46 = vadd.f32 %v1499_v45, %v4098_v61  ;;  %v1501_v49 = vpop.f32.mrb[3].mxu0  ;;  %v1814_v55 = vmax.f32 %v1496_v40, 0.0  ;;  %v1736_v63 = vadd.f32 %v1735_v54, %v1127_v50  ;;  %v1737_v0 = vpop.f32.mrb[1].mxu1 }
 0x15f   : > { %v1502_v51 = vadd.f32 %v1501_v49, %v4098_v61  ;;  %v1815_v5 = vmax.f32 %v1498_v42, 0.0  ;;  %v1738_v33 = vadd.f32 %v1737_v0, %v1127_v50  ;;  %v1739_v37 = vpop.f32.mrb[2].mxu1  ;;  %v3358_v61 = vld [vmem:[%s4598_s3 + $0x4] ss:$16 sps:$4 sm:$0xff]  }
 0x160   : > { %v1816_v60 = vmax.f32 %v1500_v46, 0.0  ;;  %v1910_v31 = vmax.f32 %v1736_v63, 0.0  ;;  %v1740_v56 = vadd.f32 %v1739_v37, %v1132_v12  ;;  %v1741_v41 = vpop.f32.mrb[3].mxu1  ;;  %2326 = vmatprep.mubr.bf16.mxu1 %v3358_v61 }
 0x161   : > { %v1817_v36 = vmax.f32 %v1502_v51, 0.0  ;;  %v1911_v27 = vmax.f32 %v1738_v33, 0.0  ;;  %v1742_v24 = vadd.f32 %v1741_v41, %v1132_v12 }
 0x162   : > { %v1942_v32 = vpack.c.bf16 %v1816_v60, %v1814_v55  ;;  %v1912_v42 = vmax.f32 %v1740_v56, 0.0  ;;  %v1137_v55 = vpop.permute.xlu0 %1136  ;;  %v1142_v56 = vpop.permute.xlu1 %1141 }
 0x163   : > { %v1943_v28 = vpack.c.bf16 %v1817_v36, %v1815_v5  ;;  %v1505_v45 = vpop.f32.mrb[4].mxu0  ;;  %v1913_v51 = vmax.f32 %v1742_v24, 0.0 }
 0x164   : > { %v1506_v40 = vadd.f32 %v1505_v45, %v4087_v57  ;;  %v1507_v46 = vpop.f32.mrb[5].mxu0  ;;  %v4325_v33 = vpack.c.bf16 %v1912_v42, %v1910_v31 }
 0x165   : > { %v1508_v49 = vadd.f32 %v1507_v46, %v4087_v57  ;;  %v1509_v50 = vpop.f32.mrb[6].mxu0  ;;  %2294 = vmatprep.subr.bf16.mxu1 %v1943_v28  ;;  %v4328_v63 = vpack.c.bf16 %v1913_v51, %v1911_v27  ;;  %v1745_v0 = vpop.f32.mrb[4].mxu1 }
 0x166   : > { %v1510_v54 = vadd.f32 %v1509_v50, %v4101_v62  ;;  %v1511_v36 = vpop.f32.mrb[7].mxu0  ;;  %2295 = vmatpush1.bf16.msra.mxu1 %v1942_v32  ;;  %4629 = vst [vmem:[#allocation13_spill] sm:$0xff] %v4325_v33  ;;  %v1818_v5 = vmax.f32 %v1506_v40, 0.0  ;;  %v1746_v37 = vadd.f32 %v1745_v0, %v1137_v55  ;;  %v1747_v57 = vpop.f32.mrb[5].mxu1 }
 0x167   : > { %v1512_v60 = vadd.f32 %v1511_v36, %v4101_v62  ;;  %v1819_v28 = vmax.f32 %v1508_v49, 0.0  ;;  %v1748_v41 = vadd.f32 %v1747_v57, %v1137_v55  ;;  %v1749_v45 = vpop.f32.mrb[6].mxu1 }
 0x168   : > { %v1820_v12 = vmax.f32 %v1510_v54, 0.0  ;;  %v1914_v46 = vmax.f32 %v1746_v37, 0.0  ;;  %v1750_v32 = vadd.f32 %v1749_v45, %v1142_v56  ;;  %v1751_v31 = vpop.f32.mrb[7].mxu1 }
 0x169   : > { %v1821_v24 = vmax.f32 %v1512_v60, 0.0  ;;  %v1915_v33 = vmax.f32 %v1748_v41, 0.0  ;;  %v1752_v62 = vadd.f32 %v1751_v31, %v1142_v56 }
 0x16a   : > { %v1944_v61 = vpack.c.bf16 %v1820_v12, %v1818_v5  ;;  %v1916_v40 = vmax.f32 %v1750_v32, 0.0  ;;  %v1147_v5 = vpop.permute.xlu0 %1146 }
 0x16b   : > { %v1945_v42 = vpack.c.bf16 %v1821_v24, %v1819_v28  ;;  %v1515_v50 = vpop.f32.mrb[8].mxu0  ;;  %v1917_v49 = vmax.f32 %v1752_v62, 0.0 }
 0x16c   : > { %v1516_v27 = vadd.f32 %v1515_v50, %v4110_v1  ;;  %v1517_v51 = vpop.f32.mrb[9].mxu0  ;;  %v4333_v0 = vpack.c.bf16 %v1916_v40, %v1914_v46 }
 0x16d   : > { %v1518_v54 = vadd.f32 %v1517_v51, %v4110_v1  ;;  %v1519_v36 = vpop.f32.mrb[10].mxu0  ;;  %2296 = vmatprep.subr.bf16.mxu1 %v1945_v42  ;;  %v4336_v37 = vpack.c.bf16 %v1917_v49, %v1915_v33  ;;  %v1755_v57 = vpop.f32.mrb[8].mxu1 }
 0x16e   : > { %v1520_v55 = vadd.f32 %v1519_v36, %v4112_v2  ;;  %v1521_v60 = vpop.f32.mrb[11].mxu0  ;;  %2297 = vmatpush1.bf16.msra.mxu1 %v1944_v61  ;;  %v1822_v56 = vmax.f32 %v1516_v27, 0.0  ;;  %v1756_v24 = vadd.f32 %v1755_v57, %v1147_v5  ;;  %v1757_v41 = vpop.f32.mrb[9].mxu1 }
 0x16f   : > { %v1522_v12 = vadd.f32 %v1521_v60, %v4112_v2  ;;  %v1152_v1 = vpop.permute.xlu1 %1151  ;;  %v1823_v45 = vmax.f32 %v1518_v54, 0.0  ;;  %v1758_v31 = vadd.f32 %v1757_v41, %v1147_v5  ;;  %v1759_v42 = vpop.f32.mrb[10].mxu1 }
 0x170   : > { %v1824_v28 = vmax.f32 %v1520_v55, 0.0  ;;  %v1918_v62 = vmax.f32 %v1756_v24, 0.0  ;;  %v1760_v61 = vadd.f32 %v1759_v42, %v1152_v1  ;;  %v1761_v46 = vpop.f32.mrb[11].mxu1 }
 0x171   : > { %v1825_v32 = vmax.f32 %v1522_v12, 0.0  ;;  %v1919_v36 = vmax.f32 %v1758_v31, 0.0  ;;  %v1762_v2 = vadd.f32 %v1761_v46, %v1152_v1 }
 0x172   : > { %v1946_v50 = vpack.c.bf16 %v1824_v28, %v1822_v56  ;;  %v1920_v27 = vmax.f32 %v1760_v61, 0.0  ;;  %v1157_v56 = vpop.permute.xlu0 %1156 }
 0x173   : > { %v1947_v51 = vpack.c.bf16 %v1825_v32, %v1823_v45  ;;  %v1525_v40 = vpop.f32.mrb[12].mxu0  ;;  %v1921_v54 = vmax.f32 %v1762_v2, 0.0 }
 0x174   : > { %v1526_v33 = vadd.f32 %v1525_v40, %v4123_v6  ;;  %v1527_v49 = vpop.f32.mrb[13].mxu0  ;;  %v4341_v57 = vpack.c.bf16 %v1920_v27, %v1918_v62 }
 0x175   : > { %v1528_v55 = vadd.f32 %v1527_v49, %v4123_v6  ;;  %v1529_v60 = vpop.f32.mrb[14].mxu0  ;;  %2298 = vmatprep.subr.bf16.mxu1 %v1947_v51  ;;  %v4344_v24 = vpack.c.bf16 %v1921_v54, %v1919_v36  ;;  %v1765_v41 = vpop.f32.mrb[12].mxu1 }
 0x176   : > { %v1530_v5 = vadd.f32 %v1529_v60, %v4126_v7  ;;  %v1531_v12 = vpop.f32.mrb[15].mxu0  ;;  %2299 = vmatpush1.bf16.msra.mxu1 %v1946_v50  ;;  %v1826_v1 = vmax.f32 %v1526_v33, 0.0  ;;  %v1766_v32 = vadd.f32 %v1765_v41, %v1157_v56  ;;  %v1767_v31 = vpop.f32.mrb[13].mxu1 }
 0x177   : > { %v1532_v28 = vadd.f32 %v1531_v12, %v4126_v7  ;;  %v1162_v6 = vpop.permute.xlu1 %1161  ;;  %v1827_v42 = vmax.f32 %v1528_v55, 0.0  ;;  %v1768_v46 = vadd.f32 %v1767_v31, %v1157_v56  ;;  %v1769_v51 = vpop.f32.mrb[14].mxu1 }
 0x178   : > { %v1828_v45 = vmax.f32 %v1530_v5, 0.0  ;;  %v1922_v2 = vmax.f32 %v1766_v32, 0.0  ;;  %v1770_v50 = vadd.f32 %v1769_v51, %v1162_v6  ;;  %v1771_v62 = vpop.f32.mrb[15].mxu1 }
 0x179   : > { %v1829_v61 = vmax.f32 %v1532_v28, 0.0  ;;  %v1923_v60 = vmax.f32 %v1768_v46, 0.0  ;;  %v1772_v7 = vadd.f32 %v1771_v62, %v1162_v6 }
 0x17a   : > { %v1948_v40 = vpack.c.bf16 %v1828_v45, %v1826_v1  ;;  %v1924_v33 = vmax.f32 %v1770_v50, 0.0  ;;  %v1167_v1 = vpop.permute.xlu0 %1166 }
 0x17b   : > { %v1949_v49 = vpack.c.bf16 %v1829_v61, %v1827_v42  ;;  %v1535_v27 = vpop.f32.mrb[16].mxu0  ;;  %v1925_v55 = vmax.f32 %v1772_v7, 0.0 }
 0x17c   : > { %v1536_v36 = vadd.f32 %v1535_v27, %v4135_v10  ;;  %v1537_v54 = vpop.f32.mrb[17].mxu0  ;;  %v4349_v41 = vpack.c.bf16 %v1924_v33, %v1922_v2 }
 0x17d   : > { %v1538_v5 = vadd.f32 %v1537_v54, %v4135_v10  ;;  %v1539_v12 = vpop.f32.mrb[18].mxu0  ;;  %2300 = vmatprep.subr.bf16.mxu1 %v1949_v49  ;;  %v4352_v32 = vpack.c.bf16 %v1925_v55, %v1923_v60  ;;  %v1775_v31 = vpop.f32.mrb[16].mxu1 }
 0x17e   : > { %v1540_v56 = vadd.f32 %v1539_v12, %v4137_v11  ;;  %v1541_v28 = vpop.f32.mrb[19].mxu0  ;;  %2301 = vmatpush1.bf16.msra.mxu1 %v1948_v40  ;;  %v1830_v6 = vmax.f32 %v1536_v36, 0.0  ;;  %v1776_v61 = vadd.f32 %v1775_v31, %v1167_v1  ;;  %v1777_v46 = vpop.f32.mrb[17].mxu1 }
 0x17f   : > { %v1542_v45 = vadd.f32 %v1541_v28, %v4137_v11  ;;  %v1172_v10 = vpop.permute.xlu1 %1171  ;;  %v1831_v51 = vmax.f32 %v1538_v5, 0.0  ;;  %v1778_v62 = vadd.f32 %v1777_v46, %v1167_v1  ;;  %v1779_v49 = vpop.f32.mrb[18].mxu1 }
 0x180   : > { %v1832_v42 = vmax.f32 %v1540_v56, 0.0  ;;  %v1926_v7 = vmax.f32 %v1776_v61, 0.0  ;;  %v1780_v40 = vadd.f32 %v1779_v49, %v1172_v10  ;;  %v1781_v2 = vpop.f32.mrb[19].mxu1 }
 0x181   : > { %v1833_v50 = vmax.f32 %v1542_v45, 0.0  ;;  %v1927_v12 = vmax.f32 %v1778_v62, 0.0  ;;  %v1782_v11 = vadd.f32 %v1781_v2, %v1172_v10 }
 0x182   : > { %v1950_v27 = vpack.c.bf16 %v1832_v42, %v1830_v6  ;;  %v1928_v36 = vmax.f32 %v1780_v40, 0.0  ;;  %v1177_v6 = vpop.permute.xlu0 %1176 }
 0x183   : > { %v1951_v54 = vpack.c.bf16 %v1833_v50, %v1831_v51  ;;  %v1545_v33 = vpop.f32.mrb[20].mxu0  ;;  %v1929_v5 = vmax.f32 %v1782_v11, 0.0 }
 0x184   : > { %v1546_v60 = vadd.f32 %v1545_v33, %v4148_v15  ;;  %v1547_v55 = vpop.f32.mrb[21].mxu0  ;;  %v4357_v31 = vpack.c.bf16 %v1928_v36, %v1926_v7 }
 0x185   : > { %v1548_v56 = vadd.f32 %v1547_v55, %v4148_v15  ;;  %v1549_v28 = vpop.f32.mrb[22].mxu0  ;;  %2302 = vmatprep.subr.bf16.mxu1 %v1951_v54  ;;  %v4360_v61 = vpack.c.bf16 %v1929_v5, %v1927_v12  ;;  %v1785_v46 = vpop.f32.mrb[20].mxu1 }
 0x186   : > { %v1550_v1 = vadd.f32 %v1549_v28, %v4151_v16  ;;  %v1551_v45 = vpop.f32.mrb[23].mxu0  ;;  %2303 = vmatpush1.bf16.msra.mxu1 %v1950_v27  ;;  %v1834_v10 = vmax.f32 %v1546_v60, 0.0  ;;  %v1786_v50 = vadd.f32 %v1785_v46, %v1177_v6  ;;  %v1787_v62 = vpop.f32.mrb[21].mxu1 }
 0x187   : > { %v1552_v42 = vadd.f32 %v1551_v45, %v4151_v16  ;;  %v1182_v15 = vpop.permute.xlu1 %1181  ;;  %v1835_v49 = vmax.f32 %v1548_v56, 0.0  ;;  %v1788_v2 = vadd.f32 %v1787_v62, %v1177_v6  ;;  %v1789_v54 = vpop.f32.mrb[22].mxu1 }
 0x188   : > { %v1836_v51 = vmax.f32 %v1550_v1, 0.0  ;;  %v1930_v11 = vmax.f32 %v1786_v50, 0.0  ;;  %v1790_v27 = vadd.f32 %v1789_v54, %v1182_v15  ;;  %v1791_v7 = vpop.f32.mrb[23].mxu1 }
 0x189   : > { %v1837_v40 = vmax.f32 %v1552_v42, 0.0  ;;  %v1931_v28 = vmax.f32 %v1788_v2, 0.0  ;;  %v1792_v16 = vadd.f32 %v1791_v7, %v1182_v15 }
 0x18a   : > { %v1952_v33 = vpack.c.bf16 %v1836_v51, %v1834_v10  ;;  %v1932_v60 = vmax.f32 %v1790_v27, 0.0  ;;  %v1187_v10 = vpop.permute.xlu0 %1186 }
 0x18b   : > { %v1953_v55 = vpack.c.bf16 %v1837_v40, %v1835_v49  ;;  %v1555_v36 = vpop.f32.mrb[24].mxu0  ;;  %v1933_v56 = vmax.f32 %v1792_v16, 0.0 }
 0x18c   : > { %v1556_v12 = vadd.f32 %v1555_v36, %v4160_v20  ;;  %v1557_v5 = vpop.f32.mrb[25].mxu0  ;;  %v4365_v46 = vpack.c.bf16 %v1932_v60, %v1930_v11 }
 0x18d   : > { %v1558_v1 = vadd.f32 %v1557_v5, %v4160_v20  ;;  %v1559_v45 = vpop.f32.mrb[26].mxu0  ;;  %2304 = vmatprep.subr.bf16.mxu1 %v1953_v55  ;;  %v4368_v50 = vpack.c.bf16 %v1933_v56, %v1931_v28  ;;  %v1795_v62 = vpop.f32.mrb[24].mxu1 }
 0x18e   : > { %v1560_v6 = vadd.f32 %v1559_v45, %v4162_v21  ;;  %v1561_v42 = vpop.f32.mrb[27].mxu0  ;;  %2305 = vmatpush1.bf16.msra.mxu1 %v1952_v33  ;;  %v1838_v15 = vmax.f32 %v1556_v12, 0.0  ;;  %v1796_v40 = vadd.f32 %v1795_v62, %v1187_v10  ;;  %v1797_v2 = vpop.f32.mrb[25].mxu1 }
 0x18f   : > { %v1562_v51 = vadd.f32 %v1561_v42, %v4162_v21  ;;  %v1192_v20 = vpop.permute.xlu1 %1191  ;;  %v1839_v54 = vmax.f32 %v1558_v1, 0.0  ;;  %v1798_v7 = vadd.f32 %v1797_v2, %v1187_v10  ;;  %v1799_v55 = vpop.f32.mrb[26].mxu1 }
 0x190   : > { %v1840_v49 = vmax.f32 %v1560_v6, 0.0  ;;  %v1934_v16 = vmax.f32 %v1796_v40, 0.0  ;;  %v1800_v33 = vadd.f32 %v1799_v55, %v1192_v20  ;;  %v1801_v11 = vpop.f32.mrb[27].mxu1 }
 0x191   : > { %v1841_v27 = vmax.f32 %v1562_v51, 0.0  ;;  %v1935_v45 = vmax.f32 %v1798_v7, 0.0  ;;  %v1802_v21 = vadd.f32 %v1801_v11, %v1192_v20 }
 0x192   : > { %v1954_v36 = vpack.c.bf16 %v1840_v49, %v1838_v15  ;;  %v1936_v12 = vmax.f32 %v1800_v33, 0.0  ;;  %v1197_v15 = vpop.permute.xlu0 %1196 }
 0x193   : > { %v1955_v5 = vpack.c.bf16 %v1841_v27, %v1839_v54  ;;  %v1565_v60 = vpop.f32.mrb[28].mxu0  ;;  %v1937_v1 = vmax.f32 %v1802_v21, 0.0 }
 0x194   : > { %v1566_v28 = vadd.f32 %v1565_v60, %v4173_v25  ;;  %v1567_v56 = vpop.f32.mrb[29].mxu0  ;;  %v4373_v62 = vpack.c.bf16 %v1936_v12, %v1934_v16 }
 0x195   : > { %v1568_v6 = vadd.f32 %v1567_v56, %v4173_v25  ;;  %v1569_v42 = vpop.f32.mrb[30].mxu0  ;;  %2306 = vmatprep.subr.bf16.mxu1 %v1955_v5  ;;  %v4376_v40 = vpack.c.bf16 %v1937_v1, %v1935_v45  ;;  %v1805_v2 = vpop.f32.mrb[28].mxu1 }
 0x196   : > { %v1570_v10 = vadd.f32 %v1569_v42, %v4176_v26  ;;  %v1571_v51 = vpop.f32.mrb[31].mxu0  ;;  %2307 = vmatpush1.bf16.msra.mxu1 %v1954_v36  ;;  %v1842_v20 = vmax.f32 %v1566_v28, 0.0  ;;  %v1806_v27 = vadd.f32 %v1805_v2, %v1197_v15  ;;  %v1807_v7 = vpop.f32.mrb[29].mxu1 }
 0x197   : > { %v1572_v49 = vadd.f32 %v1571_v51, %v4176_v26  ;;  %v1202_v25 = vpop.permute.xlu1 %1201  ;;  %v1843_v55 = vmax.f32 %v1568_v6, 0.0  ;;  %v1808_v11 = vadd.f32 %v1807_v7, %v1197_v15  ;;  %v1809_v5 = vpop.f32.mrb[30].mxu1 }
 0x198   : > { %v1844_v54 = vmax.f32 %v1570_v10, 0.0  ;;  %v1938_v21 = vmax.f32 %v1806_v27, 0.0  ;;  %v1810_v36 = vadd.f32 %v1809_v5, %v1202_v25  ;;  %v1811_v16 = vpop.f32.mrb[31].mxu1 }
 0x199   : > { %v1845_v33 = vmax.f32 %v1572_v49, 0.0  ;;  %v1939_v42 = vmax.f32 %v1808_v11, 0.0  ;;  %v1812_v26 = vadd.f32 %v1811_v16, %v1202_v25 }
 0x19a   : > { %v1956_v60 = vpack.c.bf16 %v1844_v54, %v1842_v20  ;;  %v1940_v28 = vmax.f32 %v1810_v36, 0.0 }
 0x19b   : > { %v1957_v56 = vpack.c.bf16 %v1845_v33, %v1843_v55  ;;  %v1575_v12 = vpop.f32.mrb[32].mxu0  ;;  %v1941_v6 = vmax.f32 %v1812_v26, 0.0 }
 0x19c   : > { %v1576_v45 = vadd.f32 %v1575_v12, %v4185_v29  ;;  %v1577_v1 = vpop.f32.mrb[33].mxu0  ;;  %v4381_v2 = vpack.c.bf16 %v1940_v28, %v1938_v21 }
 0x19d   : > { %v1578_v10 = vadd.f32 %v1577_v1, %v4185_v29  ;;  %v1579_v51 = vpop.f32.mrb[34].mxu0  ;;  %2308 = vmatprep.subr.bf16.mxu1 %v1957_v56  ;;  %v4384_v54 = vpack.c.bf16 %v1941_v6, %v1939_v42 }
 0x19e   : > { %v1580_v15 = vadd.f32 %v1579_v51, %v4187_v30  ;;  %v1581_v49 = vpop.f32.mrb[35].mxu0  ;;  %2309 = vmatpush1.bf16.msra.mxu1 %v1956_v60  ;;  %v1846_v27 = vmax.f32 %v1576_v45, 0.0 }
 0x19f   : > { %v1582_v20 = vadd.f32 %v1581_v49, %v4187_v30  ;;  %v1847_v25 = vmax.f32 %v1578_v10, 0.0 }
 0x1a0   : > { %v1848_v7 = vmax.f32 %v1580_v15, 0.0 }
 0x1a1   : > { %v1849_v55 = vmax.f32 %v1582_v20, 0.0 }
 0x1a2   : > { %v1958_v33 = vpack.c.bf16 %v1848_v7, %v1846_v27 }
 0x1a3   : > { %v1959_v11 = vpack.c.bf16 %v1849_v55, %v1847_v25  ;;  %v1585_v29 = vpop.f32.mrb[36].mxu0 }
 0x1a4   : > { %v1586_v5 = vadd.f32 %v1585_v29, %v4198_v34  ;;  %v1587_v36 = vpop.f32.mrb[37].mxu0 }
 0x1a5   : > { %v1588_v16 = vadd.f32 %v1587_v36, %v4198_v34  ;;  %v1589_v56 = vpop.f32.mrb[38].mxu0  ;;  %2310 = vmatprep.subr.bf16.mxu1 %v1959_v11 }
 0x1a6   : > { %v1590_v60 = vadd.f32 %v1589_v56, %v4201_v35  ;;  %v1591_v21 = vpop.f32.mrb[39].mxu0  ;;  %2311 = vmatpush1.bf16.msra.mxu1 %v1958_v33  ;;  %v1850_v12 = vmax.f32 %v1586_v5, 0.0 }
 0x1a7   : > { %v1592_v30 = vadd.f32 %v1591_v21, %v4201_v35  ;;  %v1851_v26 = vmax.f32 %v1588_v16, 0.0 }
 0x1a8   : > { %v1852_v42 = vmax.f32 %v1590_v60, 0.0 }
 0x1a9   : > { %v1853_v45 = vmax.f32 %v1592_v30, 0.0 }
 0x1aa   : > { %v1960_v1 = vpack.c.bf16 %v1852_v42, %v1850_v12 }
 0x1ab   : > { %v1961_v28 = vpack.c.bf16 %v1853_v45, %v1851_v26  ;;  %v1595_v10 = vpop.f32.mrb[40].mxu0 }
 0x1ac   : > { %v1596_v51 = vadd.f32 %v1595_v10, %v4210_v38  ;;  %v1597_v6 = vpop.f32.mrb[41].mxu0 }
 0x1ad   : > { %v1598_v34 = vadd.f32 %v1597_v6, %v4210_v38  ;;  %v1599_v15 = vpop.f32.mrb[42].mxu0  ;;  %2312 = vmatprep.subr.bf16.mxu1 %v1961_v28 }
 0x1ae   : > { %v1600_v49 = vadd.f32 %v1599_v15, %v4212_v39  ;;  %v1601_v20 = vpop.f32.mrb[43].mxu0  ;;  %2313 = vmatpush1.bf16.msra.mxu1 %v1960_v1  ;;  %v1854_v27 = vmax.f32 %v1596_v51, 0.0 }
 0x1af   : > { %v1602_v35 = vadd.f32 %v1601_v20, %v4212_v39  ;;  %v1855_v25 = vmax.f32 %v1598_v34, 0.0 }
 0x1b0   : > { %v1856_v7 = vmax.f32 %v1600_v49, 0.0 }
 0x1b1   : > { %v1857_v55 = vmax.f32 %v1602_v35, 0.0 }
 0x1b2   : > { %v1962_v33 = vpack.c.bf16 %v1856_v7, %v1854_v27 }
 0x1b3   : > { %v1963_v11 = vpack.c.bf16 %v1857_v55, %v1855_v25  ;;  %v1605_v29 = vpop.f32.mrb[44].mxu0 }
 0x1b4   : > { %v1606_v5 = vadd.f32 %v1605_v29, %v4223_v43  ;;  %v1607_v36 = vpop.f32.mrb[45].mxu0 }
 0x1b5   : > { %v1608_v38 = vadd.f32 %v1607_v36, %v4223_v43  ;;  %v1609_v16 = vpop.f32.mrb[46].mxu0  ;;  %2314 = vmatprep.subr.bf16.mxu1 %v1963_v11 }
 0x1b6   : > { %v1610_v56 = vadd.f32 %v1609_v16, %v4226_v44  ;;  %v1611_v60 = vpop.f32.mrb[47].mxu0  ;;  %2315 = vmatpush1.bf16.msra.mxu1 %v1962_v33  ;;  %v1858_v21 = vmax.f32 %v1606_v5, 0.0 }
 0x1b7   : > { %v1612_v39 = vadd.f32 %v1611_v60, %v4226_v44  ;;  %v1859_v12 = vmax.f32 %v1608_v38, 0.0 }
 0x1b8   : > { %v1860_v30 = vmax.f32 %v1610_v56, 0.0 }
 0x1b9   : > { %v1861_v42 = vmax.f32 %v1612_v39, 0.0 }
 0x1ba   : > { %v1964_v26 = vpack.c.bf16 %v1860_v30, %v1858_v21 }
 0x1bb   : > { %v1965_v45 = vpack.c.bf16 %v1861_v42, %v1859_v12  ;;  %v1615_v1 = vpop.f32.mrb[48].mxu0 }
 0x1bc   : > { %v1616_v28 = vadd.f32 %v1615_v1, %v4235_v47  ;;  %v1617_v10 = vpop.f32.mrb[49].mxu0 }
 0x1bd   : > { %v1618_v43 = vadd.f32 %v1617_v10, %v4235_v47  ;;  %v1619_v51 = vpop.f32.mrb[50].mxu0  ;;  %2316 = vmatprep.subr.bf16.mxu1 %v1965_v45 }
 0x1be   : > { %v1620_v6 = vadd.f32 %v1619_v51, %v4237_v48  ;;  %v1621_v34 = vpop.f32.mrb[51].mxu0  ;;  %2317 = vmatpush1.bf16.msra.mxu1 %v1964_v26  ;;  %v1862_v15 = vmax.f32 %v1616_v28, 0.0 }
 0x1bf   : > { %v1622_v44 = vadd.f32 %v1621_v34, %v4237_v48  ;;  %v1863_v20 = vmax.f32 %v1618_v43, 0.0 }
 0x1c0   : > { %v1864_v49 = vmax.f32 %v1620_v6, 0.0 }
 0x1c1   : > { %v1865_v35 = vmax.f32 %v1622_v44, 0.0 }
 0x1c2   : > { %v1966_v27 = vpack.c.bf16 %v1864_v49, %v1862_v15 }
 0x1c3   : > { %v1967_v7 = vpack.c.bf16 %v1865_v35, %v1863_v20  ;;  %v1625_v25 = vpop.f32.mrb[52].mxu0 }
 0x1c4   : > { %v1626_v55 = vadd.f32 %v1625_v25, %v4248_v52  ;;  %v1627_v33 = vpop.f32.mrb[53].mxu0 }
 0x1c5   : > { %v1628_v47 = vadd.f32 %v1627_v33, %v4248_v52  ;;  %v1629_v11 = vpop.f32.mrb[54].mxu0  ;;  %2318 = vmatprep.subr.bf16.mxu1 %v1967_v7 }
 0x1c6   : > { %v1630_v29 = vadd.f32 %v1629_v11, %v4251_v53  ;;  %v1631_v5 = vpop.f32.mrb[55].mxu0  ;;  %2319 = vmatpush1.bf16.msra.mxu1 %v1966_v27  ;;  %v1866_v36 = vmax.f32 %v1626_v55, 0.0 }
 0x1c7   : > { %v1632_v48 = vadd.f32 %v1631_v5, %v4251_v53  ;;  %v1867_v16 = vmax.f32 %v1628_v47, 0.0 }
 0x1c8   : > { %v1868_v38 = vmax.f32 %v1630_v29, 0.0 }
 0x1c9   : > { %v1869_v56 = vmax.f32 %v1632_v48, 0.0 }
 0x1ca   : > { %v1968_v60 = vpack.c.bf16 %v1868_v38, %v1866_v36  ;;  %v3356_v36 = vld [vmem:[%s4598_s3] ss:$16 sps:$4 sm:$0xff]  }
 0x1cb   : > { %v1969_v39 = vpack.c.bf16 %v1869_v56, %v1867_v16  ;;  %v1635_v21 = vpop.f32.mrb[56].mxu0  ;;  %v3359_v16 = vld [vmem:[%s4598_s3 + $0x24] ss:$16 sps:$4 sm:$0xff]  }
 0x1cc   : > { %v1636_v30 = vadd.f32 %v1635_v21, %v4260_v58  ;;  %v1637_v12 = vpop.f32.mrb[57].mxu0 }
 0x1cd   : > { %v1638_v52 = vadd.f32 %v1637_v12, %v4260_v58  ;;  %v1639_v42 = vpop.f32.mrb[58].mxu0  ;;  %2320 = vmatprep.subr.bf16.mxu1 %v1969_v39 }
 0x1ce   : > { %v1640_v26 = vadd.f32 %v1639_v42, %v4262_v59  ;;  %v1641_v45 = vpop.f32.mrb[59].mxu0  ;;  %2321 = vmatpush1.bf16.msra.mxu1 %v1968_v60  ;;  %v1870_v1 = vmax.f32 %v1636_v30, 0.0 }
 0x1cf   : > { %v1642_v53 = vadd.f32 %v1641_v45, %v4262_v59  ;;  %v1871_v10 = vmax.f32 %v1638_v52, 0.0 }
 0x1d0   : > { %v1872_v28 = vmax.f32 %v1640_v26, 0.0 }
 0x1d1   : > { %v1873_v43 = vmax.f32 %v1642_v53, 0.0 }
 0x1d2   : > { %v1970_v51 = vpack.c.bf16 %v1872_v28, %v1870_v1 }
 0x1d3   : > { %v1971_v6 = vpack.c.bf16 %v1873_v43, %v1871_v10  ;;  %v1645_v34 = vpop.f32.mrb[60].mxu0  ;;  %v3362_v10 = vld [vmem:[%s4598_s3 + $0x44] ss:$16 sps:$4 sm:$0xff]  }
 0x1d4   : > { %v1646_v44 = vadd.f32 %v1645_v34, %v4273_v3  ;;  %v1647_v15 = vpop.f32.mrb[61].mxu0 }
 0x1d5   : > { %v1648_v58 = vadd.f32 %v1647_v15, %v4273_v3  ;;  %v1649_v49 = vpop.f32.mrb[62].mxu0  ;;  %2322 = vmatprep.subr.bf16.mxu1 %v1971_v6 }
 0x1d6   : > { %v1650_v20 = vadd.f32 %v1649_v49, %v4276_v4  ;;  %v1651_v35 = vpop.f32.mrb[63].mxu0  ;;  %2323 = vmatpush1.bf16.msra.mxu1 %v1970_v51  ;;  %v1874_v27 = vmax.f32 %v1646_v44, 0.0 }
 0x1d7   : > { %v1652_v59 = vadd.f32 %v1651_v35, %v4276_v4  ;;  %v1875_v25 = vmax.f32 %v1648_v58, 0.0 }
 0x1d8   : > { %v1876_v7 = vmax.f32 %v1650_v20, 0.0 }
 0x1d9   : > { %v1877_v55 = vmax.f32 %v1652_v59, 0.0 }
 0x1da   : > { %v1972_v33 = vpack.c.bf16 %v1876_v7, %v1874_v27 }
 0x1db   : > { %v1973_v47 = vpack.c.bf16 %v1877_v55, %v1875_v25  ;;  %v1655_v11 = vpop.f32.mrb[64].mxu0  ;;  %v3365_v25 = vld [vmem:[%s4598_s3 + $0x64] ss:$16 sps:$4 sm:$0xff]  }
 0x1dc   : > { %v1656_v29 = vadd.f32 %v1655_v11, %v4279_v8  ;;  %v1657_v5 = vpop.f32.mrb[65].mxu0 }
 0x1dd   : > { %v1658_v3 = vadd.f32 %v1657_v5, %v4279_v8  ;;  %v1659_v48 = vpop.f32.mrb[66].mxu0  ;;  %2324 = vmatprep.subr.bf16.mxu1 %v1973_v47 }
 0x1de   : > { %v1660_v4 = vadd.f32 %v1659_v48, %v4281_v9  ;;  %v1661_v38 = vpop.f32.mrb[67].mxu0  ;;  %2325 = vmatpush1.bf16.msra.mxu1 %v1972_v33  ;;  %v1878_v60 = vmax.f32 %v1656_v29, 0.0 }
 0x1df   : > { %v1662_v56 = vadd.f32 %v1661_v38, %v4281_v9  ;;  %v1879_v21 = vmax.f32 %v1658_v3, 0.0  ;;  %v3361_v9 = vld [vmem:[%s4598_s3 + $0x20] ss:$16 sps:$4 sm:$0xff]  }
 0x1e0   : > { %v1880_v39 = vmax.f32 %v1660_v4, 0.0 }
 0x1e1   : > { %v1881_v8 = vmax.f32 %v1662_v56, 0.0  ;;  %2327 = vmatmul.mubr.bf16.vlgmr.msra.gmra.mrb[32].mxu1 %v3356_v36 }
 0x1e2   : > { %v1974_v30 = vpack.c.bf16 %v1880_v39, %v1878_v60  ;;  %2336 = vmatprep.mubr.bf16.mxu1 %v3359_v16  ;;  %v3368_v60 = vld [vmem:[%s4598_s3 + $0x84] ss:$16 sps:$4 sm:$0xff]  }
 0x1e3   : > { %v1975_v12 = vpack.c.bf16 %v1881_v8, %v1879_v21  ;;  %v1665_v52 = vpop.f32.mrb[68].mxu0 }
 0x1e4   : > { %v1666_v42 = vadd.f32 %v1665_v52, %v4286_v13  ;;  %v1667_v26 = vpop.f32.mrb[69].mxu0 }
 0x1e5   : > { %v1668_v45 = vadd.f32 %v1667_v26, %v4286_v13  ;;  %v1669_v53 = vpop.f32.mrb[70].mxu0  ;;  %2407 = vmatprep.subr.bf16.mxu1 %v1975_v12 }
 0x1e6   : > { %v1670_v1 = vadd.f32 %v1669_v53, %v4289_v14  ;;  %v1671_v28 = vpop.f32.mrb[71].mxu0  ;;  %2408 = vmatpush1.bf16.msra.mxu1 %v1974_v30  ;;  %v1882_v51 = vmax.f32 %v1666_v42, 0.0 }
 0x1e7   : > { %v1672_v43 = vadd.f32 %v1671_v28, %v4289_v14  ;;  %v1883_v34 = vmax.f32 %v1668_v45, 0.0  ;;  %v3364_v14 = vld [vmem:[%s4598_s3 + $0x40] ss:$16 sps:$4 sm:$0xff]  }
 0x1e8   : > { %v1884_v6 = vmax.f32 %v1670_v1, 0.0  ;;  %v4630_v1 = vld [vmem:[#allocation6_spill] sm:$0xff] }
 0x1e9   : > { %v1885_v13 = vmax.f32 %v1672_v43, 0.0  ;;  %2337 = vmatmul.mubr.bf16.gmra.mrb[36].mxu1 %v3361_v9  ;;  %v3371_v43 = vld [vmem:[%s4598_s3 + $0xa4] ss:$16 sps:$4 sm:$0xff]  }
 0x1ea   : > { %v1976_v44 = vpack.c.bf16 %v1884_v6, %v1882_v51  ;;  %2346 = vmatprep.mubr.bf16.mxu1 %v3362_v10 }
 0x1eb   : > { %v1977_v15 = vpack.c.bf16 %v1885_v13, %v1883_v34  ;;  %v1675_v58 = vpop.f32.mrb[72].mxu0 }
 0x1ec   : > { %v1676_v49 = vadd.f32 %v1675_v58, %v4291_v17  ;;  %v1677_v20 = vpop.f32.mrb[73].mxu0 }
 0x1ed   : > { %v1678_v35 = vadd.f32 %v1677_v20, %v4291_v17  ;;  %v1679_v59 = vpop.f32.mrb[74].mxu0  ;;  %2409 = vmatprep.subr.bf16.mxu1 %v1977_v15 }
 0x1ee   : > { %v1680_v27 = vadd.f32 %v1679_v59, %v4293_v18  ;;  %v1681_v7 = vpop.f32.mrb[75].mxu0  ;;  %2410 = vmatpush1.bf16.msra.mxu1 %v1976_v44  ;;  %v1886_v33 = vmax.f32 %v1676_v49, 0.0  ;;  %v4631_v49 = vld [vmem:[#allocation7_spill] sm:$0xff] }
 0x1ef   : > { %v1682_v55 = vadd.f32 %v1681_v7, %v4293_v18  ;;  %v1887_v11 = vmax.f32 %v1678_v35, 0.0  ;;  %v3367_v18 = vld [vmem:[%s4598_s3 + $0x60] ss:$16 sps:$4 sm:$0xff]  }
 0x1f0   : > { %v1888_v47 = vmax.f32 %v1680_v27, 0.0  ;;  %v3373_v27 = vld [vmem:[%s4598_s3 + $0xa0] ss:$16 sps:$4 sm:$0xff]  }
 0x1f1   : > { %v1889_v17 = vmax.f32 %v1682_v55, 0.0  ;;  %2347 = vmatmul.mubr.bf16.gmra.mrb[40].mxu1 %v3364_v14  ;;  %v4632_v7 = vld [vmem:[#allocation8_spill] sm:$0xff] }
 0x1f2   : > { %v1978_v29 = vpack.c.bf16 %v1888_v47, %v1886_v33  ;;  %2356 = vmatprep.mubr.bf16.mxu1 %v3365_v25  ;;  %v3374_v33 = vld [vmem:[%s4598_s3 + $0xc4] ss:$16 sps:$4 sm:$0xff]  }
 0x1f3   : > { %v1979_v5 = vpack.c.bf16 %v1889_v17, %v1887_v11  ;;  %v1685_v3 = vpop.f32.mrb[76].mxu0 }
 0x1f4   : > { %v1686_v48 = vadd.f32 %v1685_v3, %v4295_v19  ;;  %v1687_v36 = vpop.f32.mrb[77].mxu0 }
 0x1f5   : > { %v1688_v4 = vadd.f32 %v1687_v36, %v4295_v19  ;;  %v1689_v38 = vpop.f32.mrb[78].mxu0  ;;  %2411 = vmatprep.subr.bf16.mxu1 %v1979_v5 }
 0x1f6   : > { %v1690_v16 = vadd.f32 %v1689_v38, %v4297_v22  ;;  %v1691_v56 = vpop.f32.mrb[79].mxu0  ;;  %2412 = vmatpush1.bf16.msra.mxu1 %v1978_v29  ;;  %v1890_v21 = vmax.f32 %v1686_v48, 0.0 }
 0x1f7   : > { %v1692_v39 = vadd.f32 %v1691_v56, %v4297_v22  ;;  %v1891_v30 = vmax.f32 %v1688_v4, 0.0  ;;  %v3370_v22 = vld [vmem:[%s4598_s3 + $0x80] ss:$16 sps:$4 sm:$0xff]  }
 0x1f8   : > { %v1892_v8 = vmax.f32 %v1690_v16, 0.0  ;;  %v4633_v4 = vld [vmem:[#allocation9_spill] sm:$0xff] }
 0x1f9   : > { %v1893_v19 = vmax.f32 %v1692_v39, 0.0  ;;  %2357 = vmatmul.mubr.bf16.gmra.mrb[44].mxu1 %v3367_v18  ;;  %v4634_v39 = vld [vmem:[#allocation10_spill] sm:$0xff] }
 0x1fa   : > { %v1980_v12 = vpack.c.bf16 %v1892_v8, %v1890_v21  ;;  %2366 = vmatprep.mubr.bf16.mxu1 %v3368_v60  ;;  %v3376_v60 = vld [vmem:[%s4598_s3 + $0xc0] ss:$16 sps:$4 sm:$0xff]  }
 0x1fb   : > { %v1981_v52 = vpack.c.bf16 %v1893_v19, %v1891_v30  ;;  %v1695_v42 = vpop.f32.mrb[80].mxu0  ;;  %v3377_v30 = vld [vmem:[%s4598_s3 + $0xe4] ss:$16 sps:$4 sm:$0xff]  }
 0x1fc   : > { %v1696_v26 = vadd.f32 %v1695_v42, %v4299_v23  ;;  %v1697_v45 = vpop.f32.mrb[81].mxu0 }
 0x1fd   : > { %v1698_v53 = vadd.f32 %v1697_v45, %v4299_v23  ;;  %v1699_v9 = vpop.f32.mrb[82].mxu0  ;;  %2413 = vmatprep.subr.bf16.mxu1 %v1981_v52 }
 0x1fe   : > { %v1700_v28 = vadd.f32 %v1699_v9, %v4630_v1  ;;  %v1701_v10 = vpop.f32.mrb[83].mxu0  ;;  %2414 = vmatpush1.bf16.msra.mxu1 %v1980_v12  ;;  %v1894_v6 = vmax.f32 %v1696_v26, 0.0 }
 0x1ff   : > { %v1702_v51 = vadd.f32 %v1701_v10, %v4630_v1  ;;  %v1895_v13 = vmax.f32 %v1698_v53, 0.0 }
 0x200   : > { %v1896_v34 = vmax.f32 %v1700_v28, 0.0 }
 0x201   : > { %v1897_v23 = vmax.f32 %v1702_v51, 0.0  ;;  %2367 = vmatmul.mubr.bf16.gmra.mrb[48].mxu1 %v3370_v22  ;;  %v4635_v22 = vld [vmem:[#allocation11_spill] sm:$0xff] }
 0x202   : > { %v1982_v44 = vpack.c.bf16 %v1896_v34, %v1894_v6  ;;  %2376 = vmatprep.mubr.bf16.mxu1 %v3371_v43  ;;  %v3379_v51 = vld [vmem:[%s4598_s3 + $0xe0] ss:$16 sps:$4 sm:$0xff]  }
 0x203   : > { %v1983_v15 = vpack.c.bf16 %v1897_v23, %v1895_v13  ;;  %v1705_v58 = vpop.f32.mrb[84].mxu0  ;;  %v4636_v6 = vld [vmem:[#allocation12_spill] sm:$0xff]  ;;  %v3382_v23 = vld [vmem:[%s4598_s3 + $0xc] ss:$16 sps:$4 sm:$0xff]  }
 0x204   : > { %v1706_v20 = vadd.f32 %v1705_v58, %v4631_v49  ;;  %v1707_v35 = vpop.f32.mrb[85].mxu0 }
 0x205   : > { %v1708_v59 = vadd.f32 %v1707_v35, %v4631_v49  ;;  %v1709_v14 = vpop.f32.mrb[86].mxu0  ;;  %2415 = vmatprep.subr.bf16.mxu1 %v1983_v15 }
 0x206   : > { %v1710_v25 = vadd.f32 %v1709_v14, %v4632_v7  ;;  %v1711_v55 = vpop.f32.mrb[87].mxu0  ;;  %2416 = vmatpush1.bf16.msra.mxu1 %v1982_v44  ;;  %v1898_v11 = vmax.f32 %v1706_v20, 0.0  ;;  %v4637_v14 = vld [vmem:[#allocation13_spill] sm:$0xff] }
 0x207   : > { %v1712_v47 = vadd.f32 %v1711_v55, %v4632_v7  ;;  %v1899_v29 = vmax.f32 %v1708_v59, 0.0  ;;  %v2062_v7 = vpop.permute.xlu1 %2061 }
 0x208   : > { %v1900_v17 = vmax.f32 %v1710_v25, 0.0 }
 0x209   : > { %v1901_v5 = vmax.f32 %v1712_v47, 0.0  ;;  %2377 = vmatmul.mubr.bf16.gmra.mrb[52].mxu1 %v3373_v27  ;;  %v2057_v27 = vpop.permute.xlu0 %2056 }
 0x20a   : > { %v1984_v3 = vpack.c.bf16 %v1900_v17, %v1898_v11  ;;  %2386 = vmatprep.mubr.bf16.mxu1 %v3374_v33 }
 0x20b   : > { %v1985_v48 = vpack.c.bf16 %v1901_v5, %v1899_v29  ;;  %v1715_v36 = vpop.f32.mrb[88].mxu0  ;;  %v2072_v55 = vpop.permute.xlu1 %2071 }
 0x20c   : > { %v1716_v38 = vadd.f32 %v1715_v36, %v4633_v4  ;;  %v1717_v18 = vpop.f32.mrb[89].mxu0 }
 0x20d   : > { %v1718_v16 = vadd.f32 %v1717_v18, %v4633_v4  ;;  %v1719_v56 = vpop.f32.mrb[90].mxu0  ;;  %2417 = vmatprep.subr.bf16.mxu1 %v1985_v48  ;;  %v2067_v25 = vpop.permute.xlu0 %2066 }
 0x20e   : > { %v1720_v21 = vadd.f32 %v1719_v56, %v4634_v39  ;;  %v1721_v8 = vpop.f32.mrb[91].mxu0  ;;  %2418 = vmatpush1.bf16.msra.mxu1 %v1984_v3  ;;  %v1902_v12 = vmax.f32 %v1716_v38, 0.0 }
 0x20f   : > { %v1722_v19 = vadd.f32 %v1721_v8, %v4634_v39  ;;  %v1903_v42 = vmax.f32 %v1718_v16, 0.0  ;;  %v2576_v47 = vpop.permute.xlu1 %2575 }
 0x210   : > { %v1904_v52 = vmax.f32 %v1720_v21, 0.0 }
 0x211   : > { %v1905_v26 = vmax.f32 %v1722_v19, 0.0  ;;  %2387 = vmatmul.mubr.bf16.gmra.mrb[56].mxu1 %v3376_v60  ;;  %v2571_v33 = vpop.permute.xlu0 %2570 }
 0x212   : > { %v1986_v45 = vpack.c.bf16 %v1904_v52, %v1902_v12  ;;  %2396 = vmatprep.mubr.bf16.mxu1 %v3377_v30 }
 0x213   : > { %v1987_v53 = vpack.c.bf16 %v1905_v26, %v1903_v42  ;;  %v1725_v9 = vpop.f32.mrb[92].mxu0  ;;  %v2581_v17 = vpop.permute.xlu1 %2580 }
 0x214   : > { %v1726_v1 = vadd.f32 %v1725_v9, %v4635_v22  ;;  %v1727_v28 = vpop.f32.mrb[93].mxu0 }
 0x215   : > { %v1728_v10 = vadd.f32 %v1727_v28, %v4635_v22  ;;  %v1729_v43 = vpop.f32.mrb[94].mxu0  ;;  %2419 = vmatprep.subr.bf16.mxu1 %v1987_v53  ;;  %v2077_v11 = vpop.permute.xlu0 %2076 }
 0x216   : > { %v1730_v34 = vadd.f32 %v1729_v43, %v4636_v6  ;;  %v1731_v13 = vpop.f32.mrb[95].mxu0  ;;  %2420 = vmatpush1.bf16.msra.mxu1 %v1986_v45  ;;  %v1906_v15 = vmax.f32 %v1726_v1, 0.0 }
 0x217   : > { %v1732_v44 = vadd.f32 %v1731_v13, %v4636_v6  ;;  %v1907_v49 = vmax.f32 %v1728_v10, 0.0  ;;  %v2586_v5 = vpop.permute.xlu1 %2585 }
 0x218   : > { %v1908_v58 = vmax.f32 %v1730_v34, 0.0 }
 0x219   : > { %v1909_v20 = vmax.f32 %v1732_v44, 0.0  ;;  %2397 = vmatmul.mubr.bf16.gmra.mrb[60].mxu1 %v3379_v51  ;;  %v2082_v29 = vpop.permute.xlu0 %2081 }
 0x21a   : > { %v1988_v35 = vpack.c.bf16 %v1908_v58, %v1906_v15  ;;  %2439 = vmatprep.mubr.bf16.mxu1 %v3382_v23 }
 0x21b   : > { %v1989_v59 = vpack.c.bf16 %v1909_v20, %v1907_v49  ;;  %v2591_v48 = vpop.permute.xlu1 %2590 }
 0x21d   : > { %2421 = vmatprep.subr.bf16.mxu1 %v1989_v59  ;;  %v4555_v3 = vpop.permute.xlu0 %2086 }
 0x21e   : > { %2422 = vmatpush1.bf16.msra.mxu1 %v1988_v35 }
 0x21f   : > { %2423 = vmatprep.subr.bf16.mxu1 %v4328_v63  ;;  %v3380_v63 = vld [vmem:[%s4598_s3 + $0x8] ss:$16 sps:$4 sm:$0xff]   ;;  %v2596_v12 = vpop.permute.xlu1 %2595 }
 0x221   : > { %v4557_v30 = vpop.permute.xlu0 %2091 }
 0x222   : > { %2424 = vmatpush1.bf16.msra.mxu1 %v4637_v14 }
 0x223   : > { %2425 = vmatprep.subr.bf16.mxu1 %v4336_v37  ;;  %v3385_v37 = vld [vmem:[%s4598_s3 + $0x28] ss:$16 sps:$4 sm:$0xff]   ;;  %v2601_v44 = vpop.permute.xlu1 %2600 }
 0x225   : > { %v4559_v6 = vpop.permute.xlu0 %2096 }
 0x226   : > { %2426 = vmatpush1.bf16.msra.mxu1 %v4333_v0  ;;  %v3383_v0 = vld [vmem:[%s4598_s3 + $0x2c] ss:$16 sps:$4 sm:$0xff]  }
 0x227   : > { %2427 = vmatprep.subr.bf16.mxu1 %v4344_v24  ;;  %v3388_v24 = vld [vmem:[%s4598_s3 + $0x48] ss:$16 sps:$4 sm:$0xff]  }
 0x22a   : > { %2428 = vmatpush1.bf16.msra.mxu1 %v4341_v57  ;;  %v3386_v57 = vld [vmem:[%s4598_s3 + $0x4c] ss:$16 sps:$4 sm:$0xff]  }
 0x22b   : > { %2429 = vmatprep.subr.bf16.mxu1 %v4352_v32  ;;  %v3391_v32 = vld [vmem:[%s4598_s3 + $0x68] ss:$16 sps:$4 sm:$0xff]  }
 0x22e   : > { %2430 = vmatpush1.bf16.msra.mxu1 %v4349_v41  ;;  %v3389_v41 = vld [vmem:[%s4598_s3 + $0x6c] ss:$16 sps:$4 sm:$0xff]  }
 0x22f   : > { %2431 = vmatprep.subr.bf16.mxu1 %v4360_v61  ;;  %v3394_v61 = vld [vmem:[%s4598_s3 + $0x88] ss:$16 sps:$4 sm:$0xff]  }
 0x232   : > { %2432 = vmatpush1.bf16.msra.mxu1 %v4357_v31  ;;  %v3392_v31 = vld [vmem:[%s4598_s3 + $0x8c] ss:$16 sps:$4 sm:$0xff]  }
 0x233   : > { %2433 = vmatprep.subr.bf16.mxu1 %v4368_v50  ;;  %v3397_v50 = vld [vmem:[%s4598_s3 + $0xa8] ss:$16 sps:$4 sm:$0xff]  }
 0x236   : > { %2434 = vmatpush1.bf16.msra.mxu1 %v4365_v46  ;;  %v3395_v46 = vld [vmem:[%s4598_s3 + $0xac] ss:$16 sps:$4 sm:$0xff]  }
 0x237   : > { %2435 = vmatprep.subr.bf16.mxu1 %v4376_v40  ;;  %v3400_v40 = vld [vmem:[%s4598_s3 + $0xc8] ss:$16 sps:$4 sm:$0xff]  }
 0x23a   : > { %2436 = vmatpush1.bf16.msra.mxu1 %v4373_v62  ;;  %v3398_v62 = vld [vmem:[%s4598_s3 + $0xcc] ss:$16 sps:$4 sm:$0xff]  }
 0x23b   : > { %2437 = vmatprep.subr.bf16.mxu1 %v4384_v54  ;;  %v3403_v54 = vld [vmem:[%s4598_s3 + $0xe8] ss:$16 sps:$4 sm:$0xff]  }
 0x23e   : > { %2438 = vmatpush1.bf16.msra.mxu1 %v4381_v2  ;;  %v3401_v2 = vld [vmem:[%s4598_s3 + $0xec] ss:$16 sps:$4 sm:$0xff]  }
 0x241   : > { %2440 = vmatmul.mubr.bf16.vlgmr.msra.gmra.mrb[32].mxu1 %v3380_v63 }
 0x242   : > { %2449 = vmatprep.mubr.bf16.mxu1 %v3383_v0 }
 0x249   : > { %2450 = vmatmul.mubr.bf16.gmra.mrb[36].mxu1 %v3385_v37 }
 0x24a   : > { %2459 = vmatprep.mubr.bf16.mxu1 %v3386_v57 }
 0x251   : > { %2460 = vmatmul.mubr.bf16.gmra.mrb[40].mxu1 %v3388_v24  ;;  %v2102_v24 = vpop.permute.xlu0 %2101 }
 0x252   : > { %2469 = vmatprep.mubr.bf16.mxu1 %v3389_v41 }
 0x259   : > { %2470 = vmatmul.mubr.bf16.gmra.mrb[44].mxu1 %v3391_v32 }
 0x25a   : > { %2479 = vmatprep.mubr.bf16.mxu1 %v3392_v31 }
 0x261   : > { %2480 = vmatmul.mubr.bf16.gmra.mrb[48].mxu1 %v3394_v61  ;;  %v2606_v61 = vpop.permute.xlu1 %2605 }
 0x262   : > { %2489 = vmatprep.mubr.bf16.mxu1 %v3395_v46 }
 0x269   : > { %2490 = vmatmul.mubr.bf16.gmra.mrb[52].mxu1 %v3397_v50 }
 0x26a   : > { %2499 = vmatprep.mubr.bf16.mxu1 %v3398_v62 }
 0x271   : > { %2500 = vmatmul.mubr.bf16.gmra.mrb[56].mxu1 %v3400_v40 }
 0x272   : > { %2509 = vmatprep.mubr.bf16.mxu1 %v3401_v2 }
 0x279   : > { %2510 = vmatmul.mubr.bf16.gmra.mrb[60].mxu1 %v3403_v54 }
 0x314   : > { %v2441_v36 = vpop.f32.mrb[32].mxu1 }
 0x315   : > { %v3069_v4 = vadd.f32 %v2441_v36, %v2057_v27  ;;  %v2443_v38 = vpop.f32.mrb[33].mxu1 }
 0x316   : > { %v3070_v18 = vadd.f32 %v2443_v38, %v2057_v27  ;;  %v2445_v16 = vpop.f32.mrb[34].mxu1 }
 0x317   : > { %v2520_v56 = vmax.f32 %v3069_v4, 0.0  ;;  %v3071_v60 = vadd.f32 %v2445_v16, %v2062_v7  ;;  %v2447_v39 = vpop.f32.mrb[35].mxu1  ;;  %v2611_v4 = vpop.permute.xlu1 %2610 }
 0x318   : > { %v2521_v21 = vmax.f32 %v3070_v18, 0.0  ;;  %v3072_v8 = vadd.f32 %v2447_v39, %v2062_v7 }
 0x319   : > { %v2522_v19 = vmax.f32 %v3071_v60, 0.0  ;;  %v2648_v42 = vmul.f32 %v2571_v33, %v2520_v56 }
 0x31a   : > { %v2523_v52 = vmax.f32 %v3072_v8, 0.0  ;;  %v2649_v45 = vmul.f32 %v2571_v33, %v2521_v21 }
 0x31b   : > { %v2650_v26 = vmul.f32 %v2576_v47, %v2522_v19 }
 0x31c   : > { %v2651_v53 = vmul.f32 %v2576_v47, %v2523_v52  ;;  %v2451_v9 = vpop.f32.mrb[36].mxu1 }
 0x31d   : > { %v2680_v22 = vadd.f32 %v2650_v26, %v2648_v42  ;;  %v3073_v1 = vadd.f32 %v2451_v9, %v2067_v25  ;;  %v2453_v28 = vpop.f32.mrb[37].mxu1 }
 0x31e   : > { %v2701_v10 = vadd.f32 %v2651_v53, %v2649_v45  ;;  %v3074_v43 = vadd.f32 %v2453_v28, %v2067_v25  ;;  %v2455_v51 = vpop.f32.mrb[38].mxu1 }
 0x31f   : > { %v2524_v34 = vmax.f32 %v3073_v1, 0.0  ;;  %v3075_v13 = vadd.f32 %v2455_v51, %v2072_v55  ;;  %v2457_v23 = vpop.f32.mrb[39].mxu1 }
 0x320   : > { %v2525_v15 = vmax.f32 %v3074_v43, 0.0  ;;  %v3076_v58 = vadd.f32 %v2457_v23, %v2072_v55 }
 0x321   : > { %v2652_v49 = vmul.f32 %v2581_v17, %v2524_v34  ;;  %v2526_v20 = vmax.f32 %v3075_v13, 0.0 }
 0x322   : > { %v2653_v35 = vmul.f32 %v2581_v17, %v2525_v15  ;;  %v2527_v59 = vmax.f32 %v3076_v58, 0.0  ;;  %v2107_v17 = vpop.permute.xlu0 %2106 }
 0x323   : > { %v2681_v14 = vadd.f32 %v2680_v22, %v2652_v49  ;;  %v2654_v63 = vmul.f32 %v2586_v5, %v2526_v20 }
 0x324   : > { %v2702_v0 = vadd.f32 %v2701_v10, %v2653_v35  ;;  %v2655_v37 = vmul.f32 %v2586_v5, %v2527_v59  ;;  %v2461_v57 = vpop.f32.mrb[40].mxu1 }
 0x325   : > { %v2682_v41 = vadd.f32 %v2681_v14, %v2654_v63  ;;  %v3077_v32 = vadd.f32 %v2461_v57, %v2077_v11  ;;  %v2463_v31 = vpop.f32.mrb[41].mxu1 }
 0x326   : > { %v2703_v46 = vadd.f32 %v2702_v0, %v2655_v37  ;;  %v3078_v50 = vadd.f32 %v2463_v31, %v2077_v11  ;;  %v2465_v62 = vpop.f32.mrb[42].mxu1  ;;  %v2112_v26 = vpop.permute.xlu0 %2111 }
 0x327   : > { %v2528_v40 = vmax.f32 %v3077_v32, 0.0  ;;  %v3079_v2 = vadd.f32 %v2465_v62, %v2082_v29  ;;  %v2467_v54 = vpop.f32.mrb[43].mxu1 }
 0x328   : > { %v2529_v27 = vmax.f32 %v3078_v50, 0.0  ;;  %v3080_v7 = vadd.f32 %v2467_v54, %v2082_v29 }
 0x329   : > { %v2656_v25 = vmul.f32 %v2591_v48, %v2528_v40  ;;  %v2530_v55 = vmax.f32 %v3079_v2, 0.0 }
 0x32a   : > { %v2657_v33 = vmul.f32 %v2591_v48, %v2529_v27  ;;  %v2531_v47 = vmax.f32 %v3080_v7, 0.0 }
 0x32b   : > { %v2683_v5 = vadd.f32 %v2682_v41, %v2656_v25  ;;  %v2658_v36 = vmul.f32 %v2596_v12, %v2530_v55 }
 0x32c   : > { %v2704_v38 = vadd.f32 %v2703_v46, %v2657_v33  ;;  %v2659_v18 = vmul.f32 %v2596_v12, %v2531_v47  ;;  %v2471_v16 = vpop.f32.mrb[44].mxu1  ;;  %v2616_v12 = vpop.permute.xlu1 %2615 }
 0x32d   : > { %v2684_v56 = vadd.f32 %v2683_v5, %v2658_v36  ;;  %v3081_v11 = vadd.f32 %v2471_v16, %v4555_v3  ;;  %v2473_v60 = vpop.f32.mrb[45].mxu1 }
 0x32e   : > { %v2705_v39 = vadd.f32 %v2704_v38, %v2659_v18  ;;  %v3082_v21 = vadd.f32 %v2473_v60, %v4555_v3  ;;  %v2475_v8 = vpop.f32.mrb[46].mxu1 }
 0x32f   : > { %v2532_v29 = vmax.f32 %v3081_v11, 0.0  ;;  %v3083_v19 = vadd.f32 %v2475_v8, %v4557_v30  ;;  %v2477_v48 = vpop.f32.mrb[47].mxu1 }
 0x330   : > { %v2533_v52 = vmax.f32 %v3082_v21, 0.0  ;;  %v3084_v42 = vadd.f32 %v2477_v48, %v4557_v30  ;;  %v2117_v30 = vpop.permute.xlu0 %2116  ;;  %v2621_v59 = vpop.permute.xlu1 %2620 }
 0x331   : > { %v2660_v45 = vmul.f32 %v2601_v44, %v2532_v29  ;;  %v2534_v53 = vmax.f32 %v3083_v19, 0.0 }
 0x332   : > { %v2661_v9 = vmul.f32 %v2601_v44, %v2533_v52  ;;  %v2535_v22 = vmax.f32 %v3084_v42, 0.0 }
 0x333   : > { %v2685_v1 = vadd.f32 %v2684_v56, %v2660_v45  ;;  %v2662_v28 = vmul.f32 %v2606_v61, %v2534_v53 }
 0x334   : > { %v2706_v10 = vadd.f32 %v2705_v39, %v2661_v9  ;;  %v2663_v43 = vmul.f32 %v2606_v61, %v2535_v22  ;;  %v2481_v51 = vpop.f32.mrb[48].mxu1  ;;  %v2122_v50 = vpop.permute.xlu0 %2121 }
 0x335   : > { %v2686_v3 = vadd.f32 %v2685_v1, %v2662_v28  ;;  %v3085_v34 = vadd.f32 %v2481_v51, %v4559_v6  ;;  %v2483_v13 = vpop.f32.mrb[49].mxu1  ;;  %v2626_v2 = vpop.permute.xlu1 %2625 }
 0x336   : > { %v2707_v23 = vadd.f32 %v2706_v10, %v2663_v43  ;;  %v3086_v15 = vadd.f32 %v2483_v13, %v4559_v6  ;;  %v2485_v58 = vpop.f32.mrb[50].mxu1 }
 0x337   : > { %v2536_v49 = vmax.f32 %v3085_v34, 0.0  ;;  %v3087_v20 = vadd.f32 %v2485_v58, %v2102_v24  ;;  %v2487_v35 = vpop.f32.mrb[51].mxu1 }
 0x338   : > { %v2537_v44 = vmax.f32 %v3086_v15, 0.0  ;;  %v3088_v14 = vadd.f32 %v2487_v35, %v2102_v24  ;;  %v2127_v18 = vpop.permute.xlu0 %2126 }
 0x339   : > { %v2664_v63 = vmul.f32 %v2611_v4, %v2536_v49  ;;  %v2538_v0 = vmax.f32 %v3087_v20, 0.0  ;;  %v2631_v11 = vpop.permute.xlu1 %2630 }
 0x33a   : > { %v2665_v37 = vmul.f32 %v2611_v4, %v2537_v44  ;;  %v2539_v57 = vmax.f32 %v3088_v14, 0.0 }
 0x33b   : > { %v2687_v41 = vadd.f32 %v2686_v3, %v2664_v63  ;;  %v2666_v32 = vmul.f32 %v2616_v12, %v2538_v0 }
 0x33c   : > { %v2708_v31 = vadd.f32 %v2707_v23, %v2665_v37  ;;  %v2667_v61 = vmul.f32 %v2616_v12, %v2539_v57  ;;  %v2491_v46 = vpop.f32.mrb[52].mxu1  ;;  %v2132_v1 = vpop.permute.xlu0 %2131 }
 0x33d   : > { %v2688_v62 = vadd.f32 %v2687_v41, %v2666_v32  ;;  %v3089_v6 = vadd.f32 %v2491_v46, %v2107_v17  ;;  %v2493_v40 = vpop.f32.mrb[53].mxu1  ;;  %v2636_v28 = vpop.permute.xlu1 %2635 }
 0x33e   : > { %v2709_v54 = vadd.f32 %v2708_v31, %v2667_v61  ;;  %v3090_v27 = vadd.f32 %v2493_v40, %v2107_v17  ;;  %v2495_v7 = vpop.f32.mrb[54].mxu1  ;;  %v2728_v40 = vlaneseq }
 0x33f   : > { %v2540_v25 = vmax.f32 %v3089_v6, 0.0  ;;  %v3091_v55 = vadd.f32 %v2495_v7, %v2112_v26  ;;  %v2497_v24 = vpop.f32.mrb[55].mxu1 }
 0x340   : > { %v2541_v33 = vmax.f32 %v3090_v27, 0.0  ;;  %v3092_v47 = vadd.f32 %v2497_v24, %v2112_v26  ;;  %v2641_v63 = vpop.permute.xlu0 %2640  ;;  %vm2754_vm1 = vcmp.lt.s32.totalorder %v2728_v40, 256 }
 0x341   : > { %v2668_v5 = vmul.f32 %v2621_v59, %v2540_v25  ;;  %v2542_v36 = vmax.f32 %v3091_v55, 0.0  ;;  %v2646_v32 = vpop.permute.xlu1 %2645  ;;  %v2729_v25 = vshrl.u32 %v2728_v40, 7 }
 0x342   : > { %v2669_v4 = vmul.f32 %v2621_v59, %v2541_v33  ;;  %v2543_v38 = vmax.f32 %v3092_v47, 0.0  ;;  %v3559_v47 = vmov 1966171168  }
 0x343   : > { %v2689_v16 = vadd.f32 %v2688_v62, %v2668_v5  ;;  %v2670_v56 = vmul.f32 %v2626_v2, %v2542_v36  ;;  %v2738_v5 = vunpack.c.l.s4 %v3559_v47 }
 0x344   : > { %v2710_v60 = vadd.f32 %v2709_v54, %v2669_v4  ;;  %v2671_v39 = vmul.f32 %v2626_v2, %v2543_v38  ;;  %v2501_v21 = vpop.f32.mrb[56].mxu1  ;;  %v2730_v4 = vsub.s32 0, %v2729_v25 }
 0x345   : > { %v2690_v8 = vadd.f32 %v2689_v16, %v2670_v56  ;;  %v3093_v29 = vadd.f32 %v2501_v21, %v2117_v30  ;;  %v2503_v17 = vpop.f32.mrb[57].mxu1 }
 0x346   : > { %v2711_v19 = vadd.f32 %v2710_v60, %v2671_v39  ;;  %v3094_v48 = vadd.f32 %v2503_v17, %v2117_v30  ;;  %v2505_v52 = vpop.f32.mrb[58].mxu1 }
 0x347   : > { %v2544_v42 = vmax.f32 %v3093_v29, 0.0  ;;  %v3095_v45 = vadd.f32 %v2505_v52, %v2122_v50  ;;  %v2507_v26 = vpop.f32.mrb[59].mxu1 }
 0x348   : > { %v2545_v53 = vmax.f32 %v3094_v48, 0.0  ;;  %v3096_v12 = vadd.f32 %v2507_v26, %v2122_v50 }
 0x349   : > { %v2672_v9 = vmul.f32 %v2631_v11, %v2544_v42  ;;  %v2546_v22 = vmax.f32 %v3095_v45, 0.0 }
 0x34a   : > { %v2673_v10 = vmul.f32 %v2631_v11, %v2545_v53  ;;  %v2547_v43 = vmax.f32 %v3096_v12, 0.0  ;;  %v2739_v11 = vunpack.c.0.s8 %v2738_v5 }
 0x34b   : > { %v2691_v51 = vadd.f32 %v2690_v8, %v2672_v9  ;;  %v2674_v3 = vmul.f32 %v2636_v28, %v2546_v22 }
 0x34c   : > { %v2712_v34 = vadd.f32 %v2711_v19, %v2673_v10  ;;  %v2675_v13 = vmul.f32 %v2636_v28, %v2547_v43  ;;  %v2511_v23 = vpop.f32.mrb[60].mxu1  ;;  %v2742_v17 = vsub.s32 %v2739_v11, %v2729_v25 }
 0x34d   : > { %v2692_v15 = vadd.f32 %v2691_v51, %v2674_v3  ;;  %v3097_v58 = vadd.f32 %v2511_v23, %v2127_v18  ;;  %v2513_v30 = vpop.f32.mrb[61].mxu1 }
 0x34e   : > { %v2713_v49 = vadd.f32 %v2712_v34, %v2675_v13  ;;  %v3098_v20 = vadd.f32 %v2513_v30, %v2127_v18  ;;  %v2515_v35 = vpop.f32.mrb[62].mxu1  ;;  %v2726_v18 = vpop.permute.xlu0 %2725 }
 0x34f   : > { %v2548_v59 = vmax.f32 %v3097_v58, 0.0  ;;  %v3099_v44 = vadd.f32 %v2515_v35, %v2132_v1  ;;  %v2517_v14 = vpop.f32.mrb[63].mxu1  ;;  %v2731_v39 = vrot.slane %v2726_v18, %v2730_v4 }
 0x350   : > { %v2549_v0 = vmax.f32 %v3098_v20, 0.0  ;;  %v3100_v37 = vadd.f32 %v2517_v14, %v2132_v1 }
 0x351   : > { %v2676_v57 = vmul.f32 %v2641_v63, %v2548_v59  ;;  %v2550_v41 = vmax.f32 %v3099_v44, 0.0 }
 0x352   : > { %v2677_v31 = vmul.f32 %v2641_v63, %v2549_v0  ;;  %v2551_v61 = vmax.f32 %v3100_v37, 0.0 }
 0x353   : > { %v2693_v46 = vadd.f32 %v2692_v15, %v2676_v57  ;;  %v2678_v50 = vmul.f32 %v2646_v32, %v2550_v41 }
 0x354   : > { %v2714_v62 = vadd.f32 %v2713_v49, %v2677_v31  ;;  %v2679_v6 = vmul.f32 %v2646_v32, %v2551_v61 }
 0x355   : > { %v2694_v2 = vadd.f32 %v2693_v46, %v2678_v50 }
 0x356   : > { %v2715_v54 = vadd.f32 %v2714_v62, %v2679_v6 }
 0x357   : > { %v2695_v27 = vrot.slane %v2694_v2, 4 }
 0x358   : > { %v2716_v7 = vrot.slane %v2715_v54, 4 }
 0x359   : > { %v2696_v55 = vadd.f32 %v2695_v27, %v2694_v2 }
 0x35a   : > { %v2717_v24 = vadd.f32 %v2716_v7, %v2715_v54 }
 0x35b   : > { %v2697_v33 = vrot.slane %v2696_v55, 2 }
 0x35c   : > { %v2718_v36 = vrot.slane %v2717_v24, 2 }
 0x35d   : > { %v2698_v38 = vadd.f32 %v2697_v33, %v2696_v55 }
 0x35e   : > { %v2719_v16 = vadd.f32 %v2718_v36, %v2717_v24 }
 0x35f   : > { %v2699_v56 = vrot.slane %v2698_v38, 1 }
 0x360   : > { %v2720_v60 = vrot.slane %v2719_v16, 1 }
 0x361   : > { %v2700_v21 = vadd.f32 %v2699_v56, %v2698_v38 }
 0x362   : > { %v2721_v8 = vadd.f32 %v2720_v60, %v2719_v16 }
 0x363   : > { %v2732_v29 = vadd.f32 %v2731_v39, %v2700_v21 }
 0x364   : > { %v2733_v19 = vadd.f32 %v2731_v39, %v2721_v8 }
 0x366   : > { %v2736_v48 = vcombine.low %v2732_v29, %v2733_v19 }
 0x368   : > { %v2743_v52 = vrot.slane %v2736_v48, %v2742_v17 }
 0x36a   : > { %v2750_v42 = vrot.slane %v2743_v52, %v2742_v17 }
 0x36c   : > { %2756 = vst.msk [vmem:[%s742_s11] sm:$0x3] %vm2754_vm1, %v2750_v42 }
 0x36d PF: > { %s19_s9 = sadd.s32 1, %s3522_s9   ;;  %s4638_s13 = sld [smem:[#allocation4_spill]] }
 0x36e   : > { %p16_p10 = scmp.ge.s32.totalorder %s19_s9, 6   ;;  %s4639_s16 = sld [smem:[#allocation5_spill]] }
 0x36f   : > { %s4640_s26 = smov %s3502_s27  ;;  %s4641_s27 = smov %s3654_s15 }
 0x370   : > { %s4642_s28 = smov %s3514_s30  ;;  %s4643_s29 = smov %s3518_s8 }
 0x371   :  { %18 = sbr.rel (!%p16_p10) target bundleno = 7 (0x7), region = 211 }
 0x373   : > { %s4644_s30 = smov %s4638_s13 }
 0x374   : > { %s4645_s8 = smov %s4639_s16 }

</bundles_post_ra>
